<compile_context>
chip_gen: v6e
topology: v6e:2x2x1
jax: 0.10.0
libtpu: 0.0.40
codegen_flags: <defaults>
</compile_context>

<pallas_src>
import jax
import jax.numpy as jnp
from jax.experimental import pallas as pl
from jax.experimental.pallas import tpu as pltpu

EPS = 1e-6


def _pick_tm(rows):
    """Largest row-tile (<=256, multiple of 8) that divides `rows`."""
    for t in (256, 128, 64, 32, 16, 8):
        if rows % t == 0:
            return t
    return rows  # tiny / odd row counts: single block (still legal)


def _decoder_layer_kernel(x_ref, gamma_ref, beta_ref, w_ref, bias_ref, o_ref):
    """One block of rows: o = x + Linear(LayerNorm(x))   (dropout = identity)."""
    x = x_ref[...]
    if x.dtype != jnp.float32:
        x = x.astype(jnp.float32)
    h = x.shape[-1]

    # LayerNorm, PyTorch semantics: unbiased std, eps added to std.
    mean = jnp.mean(x, axis=-1, keepdims=True)
    diff = x - mean
    var_unbiased = jnp.sum(diff * diff, axis=-1, keepdims=True) / (h - 1)
    std = jnp.sqrt(var_unbiased)
    inv = pl.reciprocal(std + EPS, approx=False)  # one per-row reciprocal (EUP)
    normed = gamma_ref[...] * diff * inv + beta_ref[...]

    # Stand-in sublayer: Linear(H, H) on the MXU.
    sub = jnp.dot(normed, w_ref[...], preferred_element_type=jnp.float32)
    sub = sub + bias_ref[...]

    # Residual (dropout is identity in eval mode).
    o_ref[...] = (x + sub).astype(o_ref.dtype)


def _layernorm_kernel(x_ref, gamma_ref, beta_ref, o_ref):
    """Final Decoder.norm on one block of rows."""
    x = x_ref[...]
    if x.dtype != jnp.float32:
        x = x.astype(jnp.float32)
    h = x.shape[-1]

    mean = jnp.mean(x, axis=-1, keepdims=True)
    diff = x - mean
    var_unbiased = jnp.sum(diff * diff, axis=-1, keepdims=True) / (h - 1)
    std = jnp.sqrt(var_unbiased)
    inv = pl.reciprocal(std + EPS, approx=False)
    o_ref[...] = (gamma_ref[...] * diff * inv + beta_ref[...]).astype(o_ref.dtype)


def _row_tiled_call(kernel, x2d, extra_inputs, extra_specs):
    rows, H = x2d.shape
    tm = _pick_tm(rows)
    grid = (rows // tm,)
    row_spec = pl.BlockSpec((tm, H), lambda i: (i, 0))
    return pl.pallas_call(
        kernel,
        out_shape=jax.ShapeDtypeStruct((rows, H), x2d.dtype),
        grid=grid,
        in_specs=[row_spec] + extra_specs,
        out_specs=row_spec,
        compiler_params=pltpu.CompilerParams(
            dimension_semantics=("parallel",)),
    )(x2d, *extra_inputs)


def decoder_layer(x2d, gamma, beta, w, bias):
    H = x2d.shape[-1]
    param_spec = pl.BlockSpec((1, H), lambda i: (0, 0))   # VMEM-resident
    w_spec = pl.BlockSpec((H, H), lambda i: (0, 0))       # VMEM-resident
    return _row_tiled_call(
        _decoder_layer_kernel, x2d,
        [gamma.reshape(1, H), beta.reshape(1, H), w, bias.reshape(1, H)],
        [param_spec, param_spec, w_spec, param_spec])


def layer_norm(x2d, gamma, beta):
    H = x2d.shape[-1]
    param_spec = pl.BlockSpec((1, H), lambda i: (0, 0))
    return _row_tiled_call(
        _layernorm_kernel, x2d,
        [gamma.reshape(1, H), beta.reshape(1, H)],
        [param_spec, param_spec])


def decoder_forward(x, memory, src_mask, tgt_mask,
                    layer_params, norm_gamma, norm_beta):
    """Decoder.forward: N layers then final LayerNorm.  x: (B, S, H) f32."""
    # TODO(synk): memory / src_mask / tgt_mask are only consumed by the real
    # DecoderLayer (attention), which is not defined in the spec.
    del memory, src_mask, tgt_mask
    B, S, H = x.shape
    x2d = x.reshape(B * S, H)
    for gamma, beta, w, bias in layer_params:
        x2d = decoder_layer(x2d, gamma, beta, w, bias)
    x2d = layer_norm(x2d, norm_gamma, norm_beta)
    return x2d.reshape(B, S, H)


# ----------------------------- pure-JAX reference -----------------------------

def _layernorm_ref(x, gamma, beta):
    mean = jnp.mean(x, axis=-1, keepdims=True)
    diff = x - mean
    h = x.shape[-1]
    std = jnp.sqrt(jnp.sum(diff * diff, axis=-1, keepdims=True) / (h - 1))
    return gamma * diff / (std + EPS) + beta


def decoder_reference(x, layer_params, norm_gamma, norm_beta):
    for gamma, beta, w, bias in layer_params:
        normed = _layernorm_ref(x, gamma, beta)
        x = x + (jnp.einsum("bsh,hk->bsk", normed, w,
                            precision=jax.lax.Precision.HIGHEST) + bias)
    return _layernorm_ref(x, norm_gamma, norm_beta)


if __name__ == "__main__":
    key = jax.random.PRNGKey(0)
    B, S, H, N = 2, 256, 128, 2  # batch, tgt seq, hidden (lane-dense), layers

    kx, km, kw, kb = jax.random.split(key, 4)
    x = jax.random.normal(kx, (B, S, H), dtype=jnp.float32)
    memory = jax.random.normal(km, (B, S, H), dtype=jnp.float32)   # unused by stand-in layers
    src_mask = jnp.ones((B, 1, S), dtype=jnp.float32)
    tgt_mask = jnp.tril(jnp.ones((S, S), dtype=jnp.float32))[None]

    # clones() deep-copies one initialized layer -> all N layers share params.
    gamma = jnp.ones((H,), dtype=jnp.float32)   # LayerNorm a_2
    beta = jnp.zeros((H,), dtype=jnp.float32)   # LayerNorm b_2
    w = jax.random.normal(kw, (H, H), dtype=jnp.float32) * 0.05
    bias = jax.random.normal(kb, (H,), dtype=jnp.float32) * 0.01
    layer_params = [(gamma, beta, w, bias)] * N

    # Decoder.norm params (a_2 = ones, b_2 = zeros at init).
    norm_gamma = jnp.ones((H,), dtype=jnp.float32)
    norm_beta = jnp.zeros((H,), dtype=jnp.float32)

    out = decoder_forward(x, memory, src_mask, tgt_mask,
                          layer_params, norm_gamma, norm_beta)
    jax.block_until_ready(out)

    ref = decoder_reference(x, layer_params, norm_gamma, norm_beta)
    assert out.shape == (B, S, H)
    err = float(jnp.max(jnp.abs(out - ref)))
    assert jnp.allclose(out, ref, atol=1e-3, rtol=1e-3), f"max abs err = {err}"

    print("KERNEL_OK")
</pallas_src>

<mosaic_0001>
module attributes {stable_mosaic.version = 11 : i64} {
  func.func @_decoder_layer_kernel(%arg0: i32, %arg1: memref<256x128xf32, #tpu.memory_space<vmem>>, %arg2: memref<1x128xf32, #tpu.memory_space<vmem>>, %arg3: memref<1x128xf32, #tpu.memory_space<vmem>>, %arg4: memref<128x128xf32, #tpu.memory_space<vmem>>, %arg5: memref<1x128xf32, #tpu.memory_space<vmem>>, %arg6: memref<256x128xf32, #tpu.memory_space<vmem>>) attributes {dimension_semantics = [#tpu.dimension_semantics<parallel>], iteration_bounds = array<i64: 2>, scalar_prefetch = 0 : i64, scratch_operands = 0 : i64, tpu.core_type = #tpu.core_type<tc>, window_params = [{transform_indices = @transform_0, window_bounds = array<i64: 256, 128>}, {pipeline_mode = #tpu.pipeline_mode<synchronous>, transform_indices = @transform_1, window_bounds = array<i64: 1, 128>}, {pipeline_mode = #tpu.pipeline_mode<synchronous>, transform_indices = @transform_2, window_bounds = array<i64: 1, 128>}, {pipeline_mode = #tpu.pipeline_mode<synchronous>, transform_indices = @transform_3, window_bounds = array<i64: 128, 128>}, {pipeline_mode = #tpu.pipeline_mode<synchronous>, transform_indices = @transform_4, window_bounds = array<i64: 1, 128>}, {transform_indices = @transform_5, window_bounds = array<i64: 256, 128>}]} {
    %c0 = arith.constant 0 : index
    %c0_0 = arith.constant 0 : index
    %0 = vector.load %arg1[%c0, %c0_0] : memref<256x128xf32, #tpu.memory_space<vmem>>, vector<256x128xf32>
    %cst = arith.constant dense<0.000000e+00> : vector<256xf32>
    %1 = vector.multi_reduction <add>, %0, %cst [1] : vector<256x128xf32> to vector<256xf32>
    %2 = vector.shape_cast %1 : vector<256xf32> to vector<256x1xf32>
    %cst_1 = arith.constant 1.280000e+02 : f32
    %3 = vector.broadcast %cst_1 : f32 to vector<256x1xf32>
    %4 = arith.divf %2, %3 : vector<256x1xf32>
    %5 = vector.broadcast %4 : vector<256x1xf32> to vector<256x128xf32>
    %6 = arith.subf %0, %5 : vector<256x128xf32>
    %7 = arith.mulf %6, %6 : vector<256x128xf32>
    %cst_2 = arith.constant dense<0.000000e+00> : vector<256xf32>
    %8 = vector.multi_reduction <add>, %7, %cst_2 [1] : vector<256x128xf32> to vector<256xf32>
    %9 = vector.shape_cast %8 : vector<256xf32> to vector<256x1xf32>
    %cst_3 = arith.constant 1.270000e+02 : f32
    %10 = vector.broadcast %cst_3 : f32 to vector<256x1xf32>
    %11 = arith.divf %9, %10 : vector<256x1xf32>
    %12 = math.sqrt %11 : vector<256x1xf32>
    %cst_4 = arith.constant 9.99999997E-7 : f32
    %13 = vector.broadcast %cst_4 : f32 to vector<256x1xf32>
    %14 = arith.addf %12, %13 : vector<256x1xf32>
    %15 = tpu.reciprocal %14 : vector<256x1xf32> -> vector<256x1xf32>
    %c0_5 = arith.constant 0 : index
    %c0_6 = arith.constant 0 : index
    %16 = vector.load %arg2[%c0_5, %c0_6] : memref<1x128xf32, #tpu.memory_space<vmem>>, vector<1x128xf32>
    %17 = vector.broadcast %16 : vector<1x128xf32> to vector<256x128xf32>
    %18 = arith.mulf %17, %6 : vector<256x128xf32>
    %19 = vector.broadcast %15 : vector<256x1xf32> to vector<256x128xf32>
    %20 = arith.mulf %18, %19 : vector<256x128xf32>
    %c0_7 = arith.constant 0 : index
    %c0_8 = arith.constant 0 : index
    %21 = vector.load %arg3[%c0_7, %c0_8] : memref<1x128xf32, #tpu.memory_space<vmem>>, vector<1x128xf32>
    %22 = vector.broadcast %21 : vector<1x128xf32> to vector<256x128xf32>
    %23 = arith.addf %20, %22 : vector<256x128xf32>
    %c0_9 = arith.constant 0 : index
    %c0_10 = arith.constant 0 : index
    %24 = vector.load %arg4[%c0_9, %c0_10] : memref<128x128xf32, #tpu.memory_space<vmem>>, vector<128x128xf32>
    %cst_11 = arith.constant dense<0.000000e+00> : vector<256x128xf32>
    %25 = tpu.matmul %23, %24, %cst_11 {dimension_numbers = #tpu.dot_dimension_numbers<[1], [0], [0], [1], [0, 0, 1, 1], [], []>} : vector<256x128xf32>, vector<128x128xf32>, vector<256x128xf32> -> vector<256x128xf32>
    %c0_12 = arith.constant 0 : index
    %c0_13 = arith.constant 0 : index
    %26 = vector.load %arg5[%c0_12, %c0_13] : memref<1x128xf32, #tpu.memory_space<vmem>>, vector<1x128xf32>
    %27 = vector.broadcast %26 : vector<1x128xf32> to vector<256x128xf32>
    %28 = arith.addf %25, %27 : vector<256x128xf32>
    %29 = arith.addf %0, %28 : vector<256x128xf32>
    %c0_14 = arith.constant 0 : index
    %c0_15 = arith.constant 0 : index
    %30 = vector.load %arg6[%c0_14, %c0_15] : memref<256x128xf32, #tpu.memory_space<vmem>>, vector<256x128xf32>
    tpu.vector_store %arg6[%c0_14, %c0_15], %29 {strides = array<i32>} : memref<256x128xf32, #tpu.memory_space<vmem>>, vector<256x128xf32>,
    return
  }
  func.func @transform_0(%arg0: i32) -> (i32, i32) {
    %c0_i32 = arith.constant 0 : i32
    %c0_i32_0 = arith.constant 0 : i32
    return %arg0, %c0_i32 : i32, i32
  }
  func.func @transform_1(%arg0: i32) -> (i32, i32) {
    %c0_i32 = arith.constant 0 : i32
    %c0_i32_0 = arith.constant 0 : i32
    %c0_i32_1 = arith.constant 0 : i32
    return %c0_i32, %c0_i32_0 : i32, i32
  }
  func.func @transform_2(%arg0: i32) -> (i32, i32) {
    %c0_i32 = arith.constant 0 : i32
    %c0_i32_0 = arith.constant 0 : i32
    %c0_i32_1 = arith.constant 0 : i32
    return %c0_i32, %c0_i32_0 : i32, i32
  }
  func.func @transform_3(%arg0: i32) -> (i32, i32) {
    %c0_i32 = arith.constant 0 : i32
    %c0_i32_0 = arith.constant 0 : i32
    %c0_i32_1 = arith.constant 0 : i32
    return %c0_i32, %c0_i32_0 : i32, i32
  }
  func.func @transform_4(%arg0: i32) -> (i32, i32) {
    %c0_i32 = arith.constant 0 : i32
    %c0_i32_0 = arith.constant 0 : i32
    %c0_i32_1 = arith.constant 0 : i32
    return %c0_i32, %c0_i32_0 : i32, i32
  }
  func.func @transform_5(%arg0: i32) -> (i32, i32) {
    %c0_i32 = arith.constant 0 : i32
    %c0_i32_0 = arith.constant 0 : i32
    return %arg0, %c0_i32 : i32, i32
  }
}

</mosaic_0001>

<bundles_post_ra>
// kernel: tpu_custom_call.1
= control target key start
LH: loop header
LB: loop body
LE: loop exit
PB: predicated region body
PF: predicated region fallthrough
CT: control target
= control target key end

     0   :  { %10 = vsyncpa [#allocation3], 0  ;;  %s3133_s0 = inlined_call_operand.hbm [shape: f32[512,128], index: 0, kind: input, shape index: {}]   ;;  %s3134_s1 = inlined_call_operand.vmem [shape: f32[1,128], index: 1, kind: input, shape index: {}]   ;;  %s3135_s2 = inlined_call_operand.vmem [shape: f32[1,128], index: 2, kind: input, shape index: {}]   ;;  %s3136_s3 = inlined_call_operand.hbm [shape: f32[128,128], index: 3, kind: input, shape index: {}]   ;;  %s3137_s4 = inlined_call_operand.vmem [shape: f32[1,128], index: 4, kind: input, shape index: {}]   ;;  %s3138_s5 = inlined_call_operand.hbm [shape: f32[512,128], index: 5, kind: output, shape index: {}]  }
   0x1   :  { %12 = vsyncpa [#allocation3 + $0x1], 0 }
   0x2   :  { %13 = vsyncpa [#allocation6], 0 }
   0x3   :  { %14 = vsyncpa [#allocation4], 0 }
   0x4   :  { %16 = vsyncpa [#allocation4 + $0x1], 0  ;;  %s1921_s18 = smov 0   ;;  %s1923_s19 = smov 0  }
   0x5   :  { %s1925_s20 = smov 0   ;;  %s1927_s21 = smov 0  }
   0x6 LB: > { %s1942_s22 = sadd.s32 4294967295, %s1882_s21   ;;  %s1357_s23 = sadd.s32 4294967294, %s1882_s21   ;;  %s1882_s21 = sphi %s1927_s21, %s3221_s21   ;;  %s1878_s20 = sphi %s1925_s20, %s3220_s20   ;;  %s1874_s19 = sphi %s1923_s19, %s3219_s19   ;;  %s1870_s18 = sphi %s1921_s18, %s3218_s18  }
   0x7   : > { %p42_p0 = scmp.ne.s32.totalorder %s1874_s19, %s1870_s18  ;;  %p3139_p1 = scmp.eq.s32.totalorder %s1942_s22, 0 }
   0x8   : > { %p156_p3 = scmp.eq.s32.totalorder %s1357_s23, 1  ;;  %p1358_p5 = scmp.ge.s32.totalorder %s1882_s21, 1 }
   0x9   : > { %p1951_p4 = por %p3139_p1, %p42_p0  ;;  %p163_p7 = scmp.lt.s32.totalorder %s1882_s21, 3 }
   0xa   : > { %p1956_p6 = por %p156_p3, %p42_p0  ;;  %s1884_s27 = smov [#allocation5]  }
   0xb   : > { %s3151_s24 = scalar_select %p1951_p4, 1, 0 }
   0xc   : > { %s3152_s25 = scalar_select %p1956_p6, 1, 0 }
   0xd   : > { %p1961_p8 = pnand %p1358_p5, %p163_p7  ;;  %s181_s28 = sshll.u32 %s1884_s27, 4  ;;  %s182_s28 = int_to_ptr.vmem [resolvable:$true] %s181_s28 }
   0xe   : > { %s1975_s30 = sadd.s32 1, %s1882_s21   ;;  %s29_s6 = sadd.s32 1, %s1878_s20 }
   0xf   : > { %s3153_s26 = scalar_select %p1961_p8, 1, 0 }
  0x10   : > { %p1546_p9 = pneg %p1961_p8  ;;  %s26_s7 = ssub.s32 %s1882_s21, %s1975_s30 }
  0x11   : > { %s1771_s8 = scalar_lea.vmem %s182_s28, 2048  ;;  %p1779_p5 = scmp.lt.s32.totalorder %s182_s28, %s182_s28 }
  0x12   : > { %p1970_p11 = pnand %p1546_p9, %p3139_p1  ;;  %p1772_p13 = scmp.ne.s32.totalorder %s182_s28, %s1771_s8 }
  0x13   : > { %p1780_p7 = scmp.lt.s32.totalorder %s1771_s8, %s1771_s8 }
  0x14   : > { %p1762_p12 = pneg %p1970_p11 }
  0x15   : > { %p1781_p10 = por %p1780_p7, %p1779_p5 }
  0x16   : > { %p1774_p0 = pnand %p1772_p13, %p1762_p12 }
  0x18   : > { %p1775_p3 = pneg %p1774_p0 }
  0x1a   : > { %p1782_p2 = pnand %p1781_p10, %p1775_p3 }
  0x1c   : > { %1785 = shalt.err (!%p1782_p2)
}
  0x1d   : > { %s3140_s9 = smov 128   ;;  %s1886_s10 = smov 8  }
  0x1e   : > { %1549 = dma.hbm_to_vmem [thread:$0]  (!%p1970_p11), %s3136_s3, 2048, %s182_s28, [#allocation6], %s3140_s9, %s3140_s9, %s1886_s10  }
  0x1f   : > { %p27_p2 = scmp.eq.s32.totalorder %s26_s7, 0  ;;  %p36_p9 = scmp.ne.s32.totalorder %s1878_s20, %s1874_s19 }
  0x20   : > { %p37_p10 = scmp.eq.s32.totalorder %s1882_s21, 0  ;;  %p1559_p12 = scmp.lt.s32.totalorder %s1882_s21, 2 }
  0x21   : > { %s1995_s13 = scalar_select %p27_p2, %s1878_s20, %s29_s6  }
  0x22   : > { %p38_p13 = por %p37_p10, %p36_p9  ;;  %p3155_p0 = scmp.eq.s32.totalorder %s1942_s22, 1 }
  0x23   : > { %s198_s15 = sand.u32 1, %s1878_s20   ;;  %s1376_s16 = sshll.u32 %s1882_s21, 12 }
  0x24   : > { %p1999_p3 = por %p3155_p0, %p36_p9  ;;  %s1361_s17 = sshll.u32 %s198_s15, 8 }
  0x25   : > { %s2008_s29 = scalar_lea.hbm %s3133_s0, %s1376_s16  ;;  %s202_s28 = scalar_lea.vmem [#allocation2], %s1361_s17 }
  0x26   : > { %s3156_s14 = scalar_select %p1999_p3, 1, 0 }
  0x27   : > { %s209_s6 = sshll.u32 %s202_s28, 4  ;;  %p2010_p11 = pnand %p1559_p12, %p38_p13  ;;  %s2014_s6 = int_to_ptr.vmem [resolvable:$true] %s209_s6 }
  0x28   : > { %s2016_s8 = scalar_lea.sflag [#allocation3], %s198_s15  ;;  %s1786_s11 = scalar_lea.hbm %s2008_s29, 4096 }
  0x29   : > { %p1787_p5 = scmp.ne.s32.totalorder %s2008_s29, %s1786_s11  ;;  %p1788_p7 = pneg %p2010_p11 }
  0x2a   : > { %s1791_s17 = scalar_lea.hbm %s3133_s0, 8192  ;;  %p1792_p10 = scmp.lt.s32.totalorder %s2008_s29, %s3133_s0 }
  0x2b   : > { %p1789_p2 = pnand %p1788_p7, %p1787_p5  ;;  %p1793_p12 = scmp.lt.s32.totalorder %s1791_s17, %s1786_s11 }
  0x2d   : > { %p1790_p9 = pneg %p1789_p2  ;;  %p1794_p13 = por %p1793_p12, %p1792_p10 }
  0x2f   : > { %p1795_p0 = pnand %p1794_p13, %p1790_p9 }
  0x31   : > { %1798 = shalt.err (!%p1795_p0)
}
  0x32   : > { %s1799_s15 = scalar_lea.vmem %s2014_s6, 4096  ;;  %s1887_s28 = smov [#allocation2]  }
  0x33   : > { %p1800_p1 = scmp.ne.s32.totalorder %s2014_s6, %s1799_s15  ;;  %s1804_s9 = sshll.u32 %s1887_s28, 4  ;;  %s1805_s9 = int_to_ptr.vmem [resolvable:$false] %s1804_s9 }
  0x34   : > { %s1806_s12 = scalar_lea.vmem %s1805_s9, 8192  ;;  %p1807_p2 = scmp.lt.s32.totalorder %s2014_s6, %s1805_s9 }
  0x35   : > { %p1802_p6 = pnand %p1800_p1, %p1788_p7  ;;  %p1808_p3 = scmp.lt.s32.totalorder %s1806_s12, %s1799_s15 }
  0x37   : > { %p1803_p5 = pneg %p1802_p6  ;;  %p1809_p4 = por %p1808_p3, %p1807_p2 }
  0x39   : > { %p1810_p8 = pnand %p1809_p4, %p1803_p5 }
  0x3b   : > { %1813 = shalt.err (!%p1810_p8)
}
  0x3c   : > { %s3158_s11 = smov 128   ;;  %p3159_p1 = scmp.ne.s32.totalorder %s3153_s26, 0 }
  0x3d   : > { %1553 = dma.hbm_to_vmem [thread:$0]  (!%p2010_p11), %s2008_s29, 4096, %s2014_s6, %s2016_s8, %s3158_s11, %s3158_s11, %s1886_s10  }
  0x3e   : > { %221 = sbr.rel (%p3159_p1) target bundleno = 696 (0x2b8), region = 40 }
  0x43   : > { %s2043_s16 = sand.u32 1, %s1874_s19   ;;  %p3160_p4 = scmp.ne.s32.totalorder %s3151_s24, 0 }
  0x44   : > { %s1365_s9 = sshll.u32 %s2043_s16, 8  ;;  %s224_s17 = scalar_lea.sflag [#allocation3], %s2043_s16 }
  0x45   : > { %s2049_s7 = scalar_lea.vmem [#allocation2], %s1365_s9 }
  0x46   : > { %1857 = dma.done.wait (%p3160_p4), %s224_s17, 4096  }
  0x47   : > { %1859 = vsyncadd (%p3160_p4), %s224_s17, 4294963200  ;;  %p3161_p6 = scmp.eq.s32.totalorder %s1942_s22, 0 }
  0x49   : > { %1861 = dma.done.wait (%p3161_p6), [#allocation6], 2048   ;;  %p3162_p8 = pmov %p3161_p6 }
  0x4a   : > { %v2060_v0 = vld [vmem:[%s2049_s7] sm:$0xff]  ;;  %v2063_v1 = vld [vmem:[%s2049_s7 + $0x8] sm:$0xff]  ;;  %v2076_v4 = vld [vmem:[%s2049_s7 + $0x10] sm:$0xff]  ;;  %s2988_s15 = scalar_lea.vmem [#allocation7], %s1365_s9  ;;  %s1377_s28 = sshll.u32 %s1942_s22, 12 }
  0x4b   : > { %1863 = vsyncadd (%p3162_p8), [#allocation6], 4294965248  ;;  %292 = vadd.xlane.f32.xlu0 %v2060_v0  ;;  %294 = vadd.xlane.f32.xlu1 %v2063_v1  ;;  %v2068_v2 = vld [vmem:[%s2049_s7 + $0x80] sm:$0xff]  ;;  %v2071_v3 = vld [vmem:[%s2049_s7 + $0x88] sm:$0xff]  ;;  %s1274_s12 = sshll.u32 %s2988_s15, 4  ;;  %s3085_s17 = scalar_lea.hbm %s3138_s5, %s1377_s28  ;;  %s3087_s12 = int_to_ptr.vmem [resolvable:$true] %s1274_s12 }
  0x4c   : > { %v2079_v5 = vld [vmem:[%s2049_s7 + $0x90] sm:$0xff]  ;;  %v2084_v6 = vld [vmem:[%s2049_s7 + $0x18] sm:$0xff]  ;;  %v2092_v8 = vld [vmem:[%s2049_s7 + $0x20] sm:$0xff]  ;;  %s1261_s22 = scalar_lea.sflag [#allocation4], %s2043_s16  ;;  %s1814_s24 = scalar_lea.vmem %s3087_s12, 4096 }
  0x4d   : > { %v2087_v7 = vld [vmem:[%s2049_s7 + $0x98] sm:$0xff]  ;;  %v2095_v9 = vld [vmem:[%s2049_s7 + $0xa0] sm:$0xff]  ;;  %v2100_v10 = vld [vmem:[%s2049_s7 + $0x28] sm:$0xff]  ;;  %p1815_p3 = scmp.ne.s32.totalorder %s3087_s12, %s1814_s24  ;;  %p3215_p11 = scmp.ne.s32.totalorder %s3156_s14, 0 }
  0x4e   : > { %v2103_v11 = vld [vmem:[%s2049_s7 + $0xa8] sm:$0xff]  ;;  %v2108_v12 = vld [vmem:[%s2049_s7 + $0x30] sm:$0xff]  ;;  %v2116_v14 = vld [vmem:[%s2049_s7 + $0x38] sm:$0xff]  ;;  %s1888_s26 = smov [#allocation7]  }
  0x4f   : > { %324 = vadd.xlane.f32.xlu0 %v2068_v2  ;;  %326 = vadd.xlane.f32.xlu1 %v2071_v3  ;;  %v2111_v13 = vld [vmem:[%s2049_s7 + $0xb0] sm:$0xff]  ;;  %v2119_v15 = vld [vmem:[%s2049_s7 + $0xb8] sm:$0xff]  ;;  %v2124_v16 = vld [vmem:[%s2049_s7 + $0x40] sm:$0xff]  ;;  %p1816_p7 = pnand %p1815_p3, %p3215_p11  ;;  %s1818_s10 = sshll.u32 %s1888_s26, 4  ;;  %s1819_s10 = int_to_ptr.vmem [resolvable:$false] %s1818_s10 }
  0x50   : > { %v2127_v17 = vld [vmem:[%s2049_s7 + $0xc0] sm:$0xff]  ;;  %v2132_v18 = vld [vmem:[%s2049_s7 + $0x48] sm:$0xff]  ;;  %v2140_v20 = vld [vmem:[%s2049_s7 + $0x50] sm:$0xff]  ;;  %s1820_s29 = scalar_lea.vmem %s1819_s10, 8192  ;;  %p1821_p10 = scmp.lt.s32.totalorder %s3087_s12, %s1819_s10 }
  0x51   : > { %v2135_v19 = vld [vmem:[%s2049_s7 + $0xc8] sm:$0xff]  ;;  %v2143_v21 = vld [vmem:[%s2049_s7 + $0xd0] sm:$0xff]  ;;  %v2148_v22 = vld [vmem:[%s2049_s7 + $0x58] sm:$0xff]  ;;  %p1817_p9 = pneg %p1816_p7  ;;  %p1822_p12 = scmp.lt.s32.totalorder %s1820_s29, %s1814_s24 }
  0x52   : > { %v2151_v23 = vld [vmem:[%s2049_s7 + $0xd8] sm:$0xff]  ;;  %v2156_v24 = vld [vmem:[%s2049_s7 + $0x60] sm:$0xff]  ;;  %v2164_v26 = vld [vmem:[%s2049_s7 + $0x68] sm:$0xff] }
  0x53   : > { %296 = vadd.xlane.f32.xlu0 %v2076_v4  ;;  %328 = vadd.xlane.f32.xlu1 %v2079_v5  ;;  %v2159_v25 = vld [vmem:[%s2049_s7 + $0xe0] sm:$0xff]  ;;  %v2167_v27 = vld [vmem:[%s2049_s7 + $0xe8] sm:$0xff]  ;;  %v2172_v28 = vld [vmem:[%s2049_s7 + $0x70] sm:$0xff]  ;;  %p1823_p13 = por %p1822_p12, %p1821_p10 }
  0x54   : > { %v2175_v29 = vld [vmem:[%s2049_s7 + $0xf0] sm:$0xff]  ;;  %v2180_v30 = vld [vmem:[%s2049_s7 + $0x78] sm:$0xff] }
  0x55   : > { %v2183_v31 = vld [vmem:[%s2049_s7 + $0xf8] sm:$0xff]  ;;  %p1824_p0 = pnand %p1823_p13, %p1817_p9 }
  0x57   : > { %298 = vadd.xlane.f32.xlu0 %v2084_v6  ;;  %330 = vadd.xlane.f32.xlu1 %v2087_v7 }
  0x5b   : > { %300 = vadd.xlane.f32.xlu0 %v2092_v8  ;;  %332 = vadd.xlane.f32.xlu1 %v2095_v9 }
  0x5f   : > { %302 = vadd.xlane.f32.xlu0 %v2100_v10  ;;  %334 = vadd.xlane.f32.xlu1 %v2103_v11 }
  0x63   : > { %304 = vadd.xlane.f32.xlu0 %v2108_v12  ;;  %336 = vadd.xlane.f32.xlu1 %v2111_v13 }
  0x67   : > { %306 = vadd.xlane.f32.xlu0 %v2116_v14  ;;  %338 = vadd.xlane.f32.xlu1 %v2119_v15 }
  0x6b   : > { %308 = vadd.xlane.f32.xlu0 %v2124_v16  ;;  %340 = vadd.xlane.f32.xlu1 %v2127_v17 }
  0x6f   : > { %310 = vadd.xlane.f32.xlu0 %v2132_v18  ;;  %342 = vadd.xlane.f32.xlu1 %v2135_v19 }
  0x73   : > { %312 = vadd.xlane.f32.xlu0 %v2140_v20  ;;  %344 = vadd.xlane.f32.xlu1 %v2143_v21 }
  0x77   : > { %314 = vadd.xlane.f32.xlu0 %v2148_v22  ;;  %346 = vadd.xlane.f32.xlu1 %v2151_v23 }
  0x7b   : > { %316 = vadd.xlane.f32.xlu0 %v2156_v24  ;;  %348 = vadd.xlane.f32.xlu1 %v2159_v25 }
  0x7f   : > { %318 = vadd.xlane.f32.xlu0 %v2164_v26  ;;  %350 = vadd.xlane.f32.xlu1 %v2167_v27 }
  0x83   : > { %320 = vadd.xlane.f32.xlu0 %v2172_v28  ;;  %352 = vadd.xlane.f32.xlu1 %v2175_v29 }
  0x87   : > { %322 = vadd.xlane.f32.xlu0 %v2180_v30  ;;  %354 = vadd.xlane.f32.xlu1 %v2183_v31 }
  0xd4   : > { %v293_v32 = vpop.xlane.xlu0 %292  ;;  %v295_v33 = vpop.xlane.xlu1 %294 }
  0xd5   : > { %v357_v34 = vmul.f32 0.0078125, %v293_v32  ;;  %v358_v35 = vmul.f32 0.0078125, %v295_v33 }
  0xd7   : > { %v2188_v36 = vsub.f32 %v2060_v0, %v357_v34  ;;  %v2191_v37 = vsub.f32 %v2063_v1, %v358_v35 }
  0xd8   : > { %v325_v38 = vpop.xlane.xlu0 %324  ;;  %v327_v39 = vpop.xlane.xlu1 %326 }
  0xd9   : > { %v373_v40 = vmul.f32 0.0078125, %v325_v38  ;;  %v421_v41 = vmul.f32 %v2188_v36, %v2188_v36  ;;  %v374_v42 = vmul.f32 0.0078125, %v327_v39  ;;  %v422_v45 = vmul.f32 %v2191_v37, %v2191_v37 }
  0xdb   : > { %v2196_v43 = vsub.f32 %v2068_v2, %v373_v40  ;;  %453 = vadd.xlane.f32.xlu0 %v421_v41  ;;  %v2199_v44 = vsub.f32 %v2071_v3, %v374_v42 }
  0xdc   : > { %v297_v46 = vpop.xlane.xlu0 %296  ;;  %v329_v47 = vpop.xlane.xlu1 %328 }
  0xdd   : > { %v359_v48 = vmul.f32 0.0078125, %v297_v46  ;;  %v437_v49 = vmul.f32 %v2196_v43, %v2196_v43  ;;  %v375_v50 = vmul.f32 0.0078125, %v329_v47  ;;  %v438_v53 = vmul.f32 %v2199_v44, %v2199_v44 }
  0xdf   : > { %v2206_v51 = vsub.f32 %v2076_v4, %v359_v48  ;;  %455 = vadd.xlane.f32.xlu0 %v422_v45  ;;  %485 = vadd.xlane.f32.xlu1 %v437_v49  ;;  %v2209_v52 = vsub.f32 %v2079_v5, %v375_v50  ;;  %v963_v50 = vld [vmem:[#allocation5 + $0x78] sm:$0xff] }
  0xe0   : > { %v299_v54 = vpop.xlane.xlu0 %298  ;;  %v331_v55 = vpop.xlane.xlu1 %330  ;;  %1426 = vmatprep.subr.mxu0 %v963_v50  ;;  %1506 = vmatprep.subr.mxu1 %v963_v50 }
  0xe1   : > { %v360_v56 = vmul.f32 0.0078125, %v299_v54  ;;  %v423_v57 = vmul.f32 %v2206_v51, %v2206_v51  ;;  %v376_v58 = vmul.f32 0.0078125, %v331_v55  ;;  %v439_v60 = vmul.f32 %v2209_v52, %v2209_v52  ;;  %v962_v54 = vld [vmem:[#allocation5 + $0x70] sm:$0xff]  ;;  %1427 = vmatpush3.msra.mxu0 %v963_v50  ;;  %1522 = vmatpush3.msra.mxu1 %v963_v50 }
  0xe2   : > { %1428 = vmatprep.subr.mxu0 %v962_v54  ;;  %1507 = vmatprep.subr.mxu1 %v962_v54 }
  0xe3   : > { %v2216_v59 = vsub.f32 %v2084_v6, %v360_v56  ;;  %487 = vadd.xlane.f32.xlu1 %v438_v53  ;;  %457 = vadd.xlane.f32.xlu0 %v423_v57  ;;  %v2221_v61 = vsub.f32 %v2087_v7, %v376_v58 }
  0xe4   : > { %v301_v62 = vpop.xlane.xlu0 %300  ;;  %v333_v63 = vpop.xlane.xlu1 %332  ;;  %1429 = vmatpush3.msra.mxu0 %v962_v54  ;;  %1523 = vmatpush3.msra.mxu1 %v962_v54 }
  0xe5   : > { %v361_v0 = vmul.f32 0.0078125, %v301_v62  ;;  %v424_v1 = vmul.f32 %v2216_v59, %v2216_v59  ;;  %v377_v2 = vmul.f32 0.0078125, %v333_v63  ;;  %v440_v5 = vmul.f32 %v2221_v61, %v2221_v61 }
  0xe7   : > { %v2226_v3 = vsub.f32 %v2092_v8, %v361_v0  ;;  %489 = vadd.xlane.f32.xlu1 %v439_v60  ;;  %459 = vadd.xlane.f32.xlu0 %v424_v1  ;;  %v2229_v4 = vsub.f32 %v2095_v9, %v377_v2  ;;  %v960_v1 = vld [vmem:[#allocation5 + $0x60] sm:$0xff] }
  0xe8   : > { %v303_v6 = vpop.xlane.xlu0 %302  ;;  %v335_v7 = vpop.xlane.xlu1 %334 }
  0xe9   : > { %v362_v32 = vmul.f32 0.0078125, %v303_v6  ;;  %v425_v33 = vmul.f32 %v2226_v3, %v2226_v3  ;;  %v378_v34 = vmul.f32 0.0078125, %v335_v7  ;;  %v441_v8 = vmul.f32 %v2229_v4, %v2229_v4 }
  0xeb   : > { %v2236_v35 = vsub.f32 %v2100_v10, %v362_v32  ;;  %491 = vadd.xlane.f32.xlu1 %v440_v5  ;;  %461 = vadd.xlane.f32.xlu0 %v425_v33  ;;  %v2241_v9 = vsub.f32 %v2103_v11, %v378_v34  ;;  %v959_v32 = vld [vmem:[#allocation5 + $0x58] sm:$0xff] }
  0xec   : > { %v305_v38 = vpop.xlane.xlu0 %304  ;;  %v337_v39 = vpop.xlane.xlu1 %336 }
  0xed   : > { %v363_v40 = vmul.f32 0.0078125, %v305_v38  ;;  %v426_v41 = vmul.f32 %v2236_v35, %v2236_v35  ;;  %v379_v42 = vmul.f32 0.0078125, %v337_v39  ;;  %v442_v46 = vmul.f32 %v2241_v9, %v2241_v9 }
  0xef   : > { %v2246_v45 = vsub.f32 %v2108_v12, %v363_v40  ;;  %493 = vadd.xlane.f32.xlu1 %v441_v8  ;;  %463 = vadd.xlane.f32.xlu0 %v426_v41  ;;  %v2249_v10 = vsub.f32 %v2111_v13, %v379_v42 }
  0xf0   : > { %v307_v11 = vpop.xlane.xlu0 %306  ;;  %v339_v47 = vpop.xlane.xlu1 %338 }
  0xf1   : > { %v364_v48 = vmul.f32 0.0078125, %v307_v11  ;;  %v427_v49 = vmul.f32 %v2246_v45, %v2246_v45  ;;  %v380_v53 = vmul.f32 0.0078125, %v339_v47  ;;  %v443_v13 = vmul.f32 %v2249_v10, %v2249_v10  ;;  %v957_v11 = vld [vmem:[#allocation5 + $0x48] sm:$0xff] }
  0xf3   : > { %v2256_v12 = vsub.f32 %v2116_v14, %v364_v48  ;;  %495 = vadd.xlane.f32.xlu1 %v442_v46  ;;  %465 = vadd.xlane.f32.xlu0 %v427_v49  ;;  %v2261_v55 = vsub.f32 %v2119_v15, %v380_v53  ;;  %v961_v14 = vld [vmem:[#allocation5 + $0x68] sm:$0xff]  ;;  %v956_v53 = vld [vmem:[#allocation5 + $0x40] sm:$0xff] }
  0xf4   : > { %v309_v56 = vpop.xlane.xlu0 %308  ;;  %v341_v57 = vpop.xlane.xlu1 %340  ;;  %1430 = vmatprep.subr.mxu0 %v961_v14  ;;  %1508 = vmatprep.subr.mxu1 %v961_v14 }
  0xf5   : > { %v365_v58 = vmul.f32 0.0078125, %v309_v56  ;;  %v428_v60 = vmul.f32 %v2256_v12, %v2256_v12  ;;  %v381_v62 = vmul.f32 0.0078125, %v341_v57  ;;  %v444_v0 = vmul.f32 %v2261_v55, %v2261_v55  ;;  %1431 = vmatpush3.msra.mxu0 %v961_v14  ;;  %1524 = vmatpush3.msra.mxu1 %v961_v14 }
  0xf6   : > { %1432 = vmatprep.subr.mxu0 %v960_v1  ;;  %1509 = vmatprep.subr.mxu1 %v960_v1 }
  0xf7   : > { %v2266_v63 = vsub.f32 %v2124_v16, %v365_v58  ;;  %497 = vadd.xlane.f32.xlu1 %v443_v13  ;;  %467 = vadd.xlane.f32.xlu0 %v428_v60  ;;  %v2269_v15 = vsub.f32 %v2127_v17, %v381_v62 }
  0xf8   : > { %v311_v2 = vpop.xlane.xlu0 %310  ;;  %v343_v5 = vpop.xlane.xlu1 %342  ;;  %1433 = vmatpush3.msra.mxu0 %v960_v1  ;;  %1525 = vmatpush3.msra.mxu1 %v960_v1  ;;  %v954_v1 = vld [vmem:[#allocation5 + $0x30] sm:$0xff] }
  0xf9   : > { %v366_v6 = vmul.f32 0.0078125, %v311_v2  ;;  %v429_v7 = vmul.f32 %v2266_v63, %v2266_v63  ;;  %v382_v16 = vmul.f32 0.0078125, %v343_v5  ;;  %v445_v33 = vmul.f32 %v2269_v15, %v2269_v15  ;;  %1434 = vmatprep.subr.mxu0 %v959_v32  ;;  %1510 = vmatprep.subr.mxu1 %v959_v32 }
  0xfa   : > { %1435 = vmatpush3.msra.mxu0 %v959_v32  ;;  %1526 = vmatpush3.msra.mxu1 %v959_v32 }
  0xfb   : > { %v2276_v17 = vsub.f32 %v2132_v18, %v366_v6  ;;  %499 = vadd.xlane.f32.xlu1 %v444_v0  ;;  %469 = vadd.xlane.f32.xlu0 %v429_v7  ;;  %v2281_v34 = vsub.f32 %v2135_v19, %v382_v16  ;;  %v958_v18 = vld [vmem:[#allocation5 + $0x50] sm:$0xff]  ;;  %v953_v16 = vld [vmem:[#allocation5 + $0x28] sm:$0xff] }
  0xfc   : > { %v313_v8 = vpop.xlane.xlu0 %312  ;;  %v345_v38 = vpop.xlane.xlu1 %344  ;;  %1436 = vmatprep.subr.mxu0 %v958_v18  ;;  %1511 = vmatprep.subr.mxu1 %v958_v18 }
  0xfd   : > { %3163 = vst [vmem:[#allocation11_spill] sm:$0xff] %v2281_v34  ;;  %v367_v39 = vmul.f32 0.0078125, %v313_v8  ;;  %v430_v40 = vmul.f32 %v2276_v17, %v2276_v17  ;;  %v383_v41 = vmul.f32 0.0078125, %v345_v38  ;;  %v446_v46 = vmul.f32 %v2281_v34, %v2281_v34  ;;  %1437 = vmatpush3.msra.mxu0 %v958_v18  ;;  %1527 = vmatpush3.msra.mxu1 %v958_v18  ;;  %v952_v18 = vld [vmem:[#allocation5 + $0x20] sm:$0xff] }
  0xfe   : > { %1438 = vmatprep.subr.mxu0 %v957_v11  ;;  %1512 = vmatprep.subr.mxu1 %v957_v11 }
  0xff   : > { %v2286_v42 = vsub.f32 %v2140_v20, %v367_v39  ;;  %501 = vadd.xlane.f32.xlu1 %v445_v33  ;;  %471 = vadd.xlane.f32.xlu0 %v430_v40  ;;  %v2289_v19 = vsub.f32 %v2143_v21, %v383_v41  ;;  %v2324_v39 = vld [vmem:[%s3134_s1] ss:$0 sm:$0xff] }
 0x100   : > { %v315_v47 = vpop.xlane.xlu0 %314  ;;  %v347_v48 = vpop.xlane.xlu1 %346  ;;  %1439 = vmatpush3.msra.mxu0 %v957_v11  ;;  %1528 = vmatpush3.msra.mxu1 %v957_v11 }
 0x101   : > { %3164 = vst [vmem:[#allocation12_spill] sm:$0xff] %v2289_v19  ;;  %v368_v49 = vmul.f32 0.0078125, %v315_v47  ;;  %v431_v50 = vmul.f32 %v2286_v42, %v2286_v42  ;;  %v384_v20 = vmul.f32 0.0078125, %v347_v48  ;;  %v447_v13 = vmul.f32 %v2289_v19, %v2289_v19  ;;  %1440 = vmatprep.subr.mxu0 %v956_v53  ;;  %1513 = vmatprep.subr.mxu1 %v956_v53  ;;  %v951_v48 = vld [vmem:[#allocation5 + $0x18] sm:$0xff] }
 0x102   : > { %1441 = vmatpush3.msra.mxu0 %v956_v53  ;;  %1529 = vmatpush3.msra.mxu1 %v956_v53 }
 0x103   : > { %v2296_v21 = vsub.f32 %v2148_v22, %v368_v49  ;;  %503 = vadd.xlane.f32.xlu1 %v446_v46  ;;  %473 = vadd.xlane.f32.xlu0 %v431_v50  ;;  %v2301_v54 = vsub.f32 %v2151_v23, %v384_v20  ;;  %v955_v22 = vld [vmem:[#allocation5 + $0x38] sm:$0xff] }
 0x104   : > { %v317_v56 = vpop.xlane.xlu0 %316  ;;  %v349_v57 = vpop.xlane.xlu1 %348  ;;  %1442 = vmatprep.subr.mxu0 %v955_v22  ;;  %1514 = vmatprep.subr.mxu1 %v955_v22 }
 0x105   : > { %3165 = vst [vmem:[#allocation13_spill] sm:$0xff] %v2296_v21  ;;  %3166 = vst [vmem:[#allocation14_spill] sm:$0xff] %v2301_v54  ;;  %v369_v58 = vmul.f32 0.0078125, %v317_v56  ;;  %v432_v60 = vmul.f32 %v2296_v21, %v2296_v21  ;;  %v385_v62 = vmul.f32 0.0078125, %v349_v57  ;;  %v448_v0 = vmul.f32 %v2301_v54, %v2301_v54  ;;  %1443 = vmatpush3.msra.mxu0 %v955_v22  ;;  %v950_v57 = vld [vmem:[#allocation5 + $0x10] sm:$0xff] }
 0x106   : > { %1530 = vmatpush3.msra.mxu1 %v955_v22  ;;  %1444 = vmatprep.subr.mxu0 %v954_v1 }
 0x107   : > { %v2306_v14 = vsub.f32 %v2156_v24, %v369_v58  ;;  %505 = vadd.xlane.f32.xlu1 %v447_v13  ;;  %475 = vadd.xlane.f32.xlu0 %v432_v60  ;;  %v2309_v23 = vsub.f32 %v2159_v25, %v385_v62 }
 0x108   : > { %v319_v2 = vpop.xlane.xlu0 %318  ;;  %v351_v5 = vpop.xlane.xlu1 %350  ;;  %1515 = vmatprep.subr.mxu1 %v954_v1  ;;  %1445 = vmatpush3.msra.mxu0 %v954_v1 }
 0x109   : > { %3167 = vst [vmem:[#allocation15_spill] sm:$0xff] %v2306_v14  ;;  %3168 = vst [vmem:[#allocation16_spill] sm:$0xff] %v2309_v23  ;;  %v370_v6 = vmul.f32 0.0078125, %v319_v2  ;;  %v433_v7 = vmul.f32 %v2306_v14, %v2306_v14  ;;  %v386_v24 = vmul.f32 0.0078125, %v351_v5  ;;  %v449_v32 = vmul.f32 %v2309_v23, %v2309_v23  ;;  %1531 = vmatpush3.msra.mxu1 %v954_v1  ;;  %v948_v2 = vld [vmem:[#allocation5] sm:$0xff] }
 0x10a   : > { %1446 = vmatprep.subr.mxu0 %v953_v16  ;;  %1516 = vmatprep.subr.mxu1 %v953_v16 }
 0x10b   : > { %v2316_v25 = vsub.f32 %v2164_v26, %v370_v6  ;;  %507 = vadd.xlane.f32.xlu1 %v448_v0  ;;  %477 = vadd.xlane.f32.xlu0 %v433_v7  ;;  %v418_v33 = vsub.f32 %v2167_v27, %v386_v24  ;;  %v949_v0 = vld [vmem:[#allocation5 + $0x8] sm:$0xff] }
 0x10c   : > { %v321_v8 = vpop.xlane.xlu0 %320  ;;  %v353_v38 = vpop.xlane.xlu1 %352  ;;  %1447 = vmatpush3.msra.mxu0 %v953_v16  ;;  %1532 = vmatpush3.msra.mxu1 %v953_v16 }
 0x10d   : > { %3169 = vst [vmem:[#allocation17_spill] sm:$0xff] %v2316_v25  ;;  %v371_v40 = vmul.f32 0.0078125, %v321_v8  ;;  %v434_v26 = vmul.f32 %v2316_v25, %v2316_v25  ;;  %v387_v41 = vmul.f32 0.0078125, %v353_v38  ;;  %v2329_v46 = vmul.f32 %v2324_v39, %v418_v33  ;;  %1448 = vmatprep.subr.mxu0 %v952_v18  ;;  %1517 = vmatprep.subr.mxu1 %v952_v18 }
 0x10e   : > { %v450_v47 = vmul.f32 %v418_v33, %v418_v33  ;;  %1449 = vmatpush3.msra.mxu0 %v952_v18  ;;  %1533 = vmatpush3.msra.mxu1 %v952_v18 }
 0x10f   : > { %3170 = vst [vmem:[#allocation18_spill] sm:$0xff] %v2329_v46  ;;  %v403_v27 = vsub.f32 %v2172_v28, %v371_v40  ;;  %509 = vadd.xlane.f32.xlu1 %v449_v32  ;;  %479 = vadd.xlane.f32.xlu0 %v434_v26  ;;  %v419_v11 = vsub.f32 %v2175_v29, %v387_v41 }
 0x110   : > { %v323_v49 = vpop.xlane.xlu0 %322  ;;  %v355_v50 = vpop.xlane.xlu1 %354  ;;  %1450 = vmatprep.subr.mxu0 %v951_v48  ;;  %1518 = vmatprep.subr.mxu1 %v951_v48 }
 0x111   : > { %v2334_v20 = vmul.f32 %v2324_v39, %v403_v27  ;;  %v2337_v53 = vmul.f32 %v2324_v39, %v419_v11  ;;  %v372_v13 = vmul.f32 0.0078125, %v323_v49  ;;  %v435_v56 = vmul.f32 %v403_v27, %v403_v27  ;;  %1451 = vmatpush3.msra.mxu0 %v951_v48  ;;  %1534 = vmatpush3.msra.mxu1 %v951_v48 }
 0x112   : > { %v388_v28 = vmul.f32 0.0078125, %v355_v50  ;;  %v451_v58 = vmul.f32 %v419_v11, %v419_v11  ;;  %1452 = vmatprep.subr.mxu0 %v950_v57  ;;  %1519 = vmatprep.subr.mxu1 %v950_v57  ;;  %v2361_v48 = vmul.f32 %v2324_v39, %v2199_v44  ;;  %v2379_v44 = vmul.f32 %v2324_v39, %v2209_v52 }
 0x113   : > { %3171 = vst [vmem:[#allocation19_spill] sm:$0xff] %v2334_v20  ;;  %3172 = vst [vmem:[#allocation20_spill] sm:$0xff] %v2337_v53  ;;  %v404_v29 = vsub.f32 %v2180_v30, %v372_v13  ;;  %511 = vadd.xlane.f32.xlu1 %v450_v47  ;;  %481 = vadd.xlane.f32.xlu0 %v435_v56  ;;  %v2357_v47 = vmul.f32 %v2324_v39, %v2191_v37 }
 0x114   : > { %v420_v60 = vsub.f32 %v2183_v31, %v388_v28  ;;  %1453 = vmatpush3.msra.mxu0 %v950_v57  ;;  %1535 = vmatpush3.msra.mxu1 %v950_v57  ;;  %v2365_v56 = vmul.f32 %v2324_v39, %v2188_v36  ;;  %v2369_v57 = vmul.f32 %v2324_v39, %v2206_v51 }
 0x115   : > { %v2342_v62 = vmul.f32 %v2324_v39, %v404_v29  ;;  %v436_v22 = vmul.f32 %v404_v29, %v404_v29  ;;  %1454 = vmatprep.subr.mxu0 %v949_v0  ;;  %1520 = vmatprep.subr.mxu1 %v949_v0  ;;  %v2375_v37 = vmul.f32 %v2324_v39, %v2196_v43 }
 0x116   : > { %v2345_v1 = vmul.f32 %v2324_v39, %v420_v60  ;;  %v452_v30 = vmul.f32 %v420_v60, %v420_v60  ;;  %1455 = vmatpush3.msra.mxu0 %v949_v0  ;;  %1536 = vmatpush3.msra.mxu1 %v949_v0  ;;  %v2388_v0 = vmul.f32 %v2324_v39, %v2216_v59 }
 0x117   : > { %3173 = vst [vmem:[#allocation21_spill] sm:$0xff] %v2342_v62  ;;  %513 = vadd.xlane.f32.xlu1 %v451_v58  ;;  %483 = vadd.xlane.f32.xlu0 %v436_v22  ;;  %v2392_v43 = vmul.f32 %v2324_v39, %v2221_v61  ;;  %v2405_v59 = vmul.f32 %v2324_v39, %v2229_v4 }
 0x118   : > { %3174 = vst [vmem:[#allocation22_spill] sm:$0xff] %v2345_v1  ;;  %1456 = vmatprep.subr.mxu0 %v948_v2  ;;  %1521 = vmatprep.subr.mxu1 %v948_v2 }
 0x119   : > { %1457 = vmatpush3.msra.mxu0 %v948_v2  ;;  %1537 = vmatpush3.msra.mxu1 %v948_v2 }
 0x11b   : > { %515 = vadd.xlane.f32.xlu1 %v452_v30 }
 0x164   : > { %v454_v31 = vpop.xlane.xlu0 %453 }
 0x165   : > { %v518_v5 = vmul.f32 0.007874016, %v454_v31 }
 0x167   : > { %1599 = vrsqrt.f32 %v518_v5  ;;  %vm552_vm0 = vcmp.eq.f32.partialorder %v518_v5, inf  ;;  %v555_v29 = vand.u32 2147483648, %v518_v5  ;;  %vm554_vm1 = vcmp.eq.f32.partialorder %v518_v5, 0.0 }
 0x168   : > { %v486_v6 = vpop.xlane.xlu1 %485  ;;  %v456_v7 = vpop.xlane.xlu0 %455 }
 0x169   : > { %v519_v24 = vmul.f32 0.007874016, %v456_v7  ;;  %v2347_v16 = vmul.f32 0.007874016, %v486_v6  ;;  %v2398_v6 = vmul.f32 %v2324_v39, %v2226_v3 }
 0x16b   : > { %1601 = vrsqrt.f32 %v519_v24  ;;  %vm559_vm2 = vcmp.eq.f32.partialorder %v519_v24, inf  ;;  %v562_v7 = vand.u32 2147483648, %v519_v24  ;;  %vm561_vm3 = vcmp.eq.f32.partialorder %v519_v24, 0.0 }
 0x16c   : > { %v488_v32 = vpop.xlane.xlu1 %487  ;;  %v458_v33 = vpop.xlane.xlu0 %457  ;;  %1603 = vrsqrt.f32 %v2347_v16  ;;  %vm664_vm4 = vcmp.eq.f32.partialorder %v2347_v16, inf  ;;  %vm666_vm5 = vcmp.eq.f32.partialorder %v2347_v16, 0.0 }
 0x16d   : > { %v2350_v8 = vmul.f32 0.007874016, %v458_v33  ;;  %v2353_v11 = vmul.f32 0.007874016, %v488_v32  ;;  %v2410_v33 = vmul.f32 %v2324_v39, %v2236_v35  ;;  %v2425_v35 = vmul.f32 %v2324_v39, %v2246_v45 }
 0x16e   : > { %v2444_v45 = vmul.f32 %v2324_v39, %v2266_v63 }
 0x16f   : > { %1605 = vrsqrt.f32 %v2350_v8  ;;  %vm671_vm6 = vcmp.eq.f32.partialorder %v2353_v11, inf  ;;  %vm566_vm7 = vcmp.eq.f32.partialorder %v2350_v8, inf  ;;  %vm568_vm8 = vcmp.eq.f32.partialorder %v2350_v8, 0.0 }
 0x170   : > { %v490_v38 = vpop.xlane.xlu1 %489  ;;  %v460_v40 = vpop.xlane.xlu0 %459  ;;  %1607 = vrsqrt.f32 %v2353_v11  ;;  %vm673_vm11 = vcmp.eq.f32.partialorder %v2353_v11, 0.0 }
 0x171   : > { %v2371_v58 = vmul.f32 0.007874016, %v490_v38  ;;  %v2381_v36 = vmul.f32 0.007874016, %v460_v40  ;;  %v2417_v40 = vmul.f32 %v2324_v39, %v2241_v9 }
 0x173   : > { %1609 = vrsqrt.f32 %v2371_v58  ;;  %vm678_vm9 = vcmp.eq.f32.partialorder %v2371_v58, inf  ;;  %vm573_vm10 = vcmp.eq.f32.partialorder %v2381_v36, inf  ;;  %vm575_vm14 = vcmp.eq.f32.partialorder %v2381_v36, 0.0 }
 0x174   : > { %v1600_v26 = vpop.eup %1599  ;;  %v492_v41 = vpop.xlane.xlu1 %491  ;;  %1611 = vrsqrt.f32 %v2381_v36 }
 0x175   : > { %v462_v18 = vpop.xlane.xlu0 %461  ;;  %v551_v27 = vmul.f32 %v1600_v26, %v518_v5  ;;  %v2384_v51 = vmul.f32 0.007874016, %v492_v41 }
 0x176   : > { %v2394_v30 = vmul.f32 0.007874016, %v462_v18 }
 0x177   : > { %v553_v49 = vsel %vm552_vm0, %v518_v5, %v551_v27  ;;  %1613 = vrsqrt.f32 %v2384_v51  ;;  %v2429_v27 = vmul.f32 %v2324_v39, %v2249_v10  ;;  %v2448_v10 = vmul.f32 %v2324_v39, %v2269_v15 }
 0x178   : > { %v494_v50 = vpop.xlane.xlu1 %493  ;;  %v1602_v28 = vpop.eup %1601  ;;  %v556_v22 = vsel %vm554_vm1, %v555_v29, %v553_v49  ;;  %1615 = vrsqrt.f32 %v2394_v30  ;;  %v2436_v49 = vmul.f32 %v2324_v39, %v2256_v12  ;;  %v2454_v12 = vmul.f32 %v2324_v39, %v2276_v17 }
 0x179   : > { %v464_v13 = vpop.xlane.xlu0 %463  ;;  %v558_v60 = vmul.f32 %v1602_v28, %v519_v24  ;;  %v1604_v5 = vpop.eup %1603  ;;  %v2401_v32 = vmul.f32 0.007874016, %v494_v50  ;;  %v774_v61 = vadd.f32 1e-06, %v556_v22  ;;  %v2440_v50 = vmul.f32 %v2324_v39, %v2261_v55  ;;  %3175 = vst [vmem:[#allocation23_spill] sm:$0xff] %v2448_v10 }
 0x17a   : > { %v2413_v3 = vmul.f32 0.007874016, %v464_v13  ;;  %v663_v4 = vmul.f32 %v1604_v5, %v2347_v16  ;;  %v2461_v15 = vmul.f32 %v2324_v39, %v2286_v42  ;;  %v569_v5 = vand.u32 2147483648, %v2350_v8 }
 0x17b   : > { %v560_v52 = vsel %vm559_vm2, %v519_v24, %v558_v60  ;;  %1617 = vrsqrt.f32 %v2401_v32  ;;  %v667_v60 = vand.u32 2147483648, %v2347_v16  ;;  %vm685_vm12 = vcmp.eq.f32.partialorder %v2384_v51, inf }
 0x17c   : > { %v496_v2 = vpop.xlane.xlu1 %495  ;;  %v563_v38 = vsel %vm561_vm3, %v562_v7, %v560_v52  ;;  %v1606_v18 = vpop.eup %1605  ;;  %1619 = vrcp.f32 %v774_v61  ;;  %v665_v55 = vsel %vm664_vm4, %v2347_v16, %v663_v4  ;;  %3176 = vst [vmem:[#allocation24_spill] sm:$0xff] %v2461_v15  ;;  %vm580_vm13 = vcmp.eq.f32.partialorder %v2394_v30, inf }
 0x17d   : > { %v466_v31 = vpop.xlane.xlu0 %465  ;;  %v2421_v24 = vmul.f32 0.007874016, %v496_v2  ;;  %v775_v13 = vadd.f32 1e-06, %v563_v38  ;;  %1621 = vrsqrt.f32 %v2413_v3  ;;  %v565_v28 = vmul.f32 %v1606_v18, %v2350_v8  ;;  %v1608_v39 = vpop.eup %1607 }
 0x17e   : > { %v2432_v9 = vmul.f32 0.007874016, %v466_v31  ;;  %v668_v42 = vsel %vm666_vm5, %v667_v60, %v665_v55  ;;  %v670_v55 = vmul.f32 %v1608_v39, %v2353_v11  ;;  %vm692_vm15 = vcmp.eq.f32.partialorder %v2401_v32, inf }
 0x17f   : > { %1623 = vrsqrt.f32 %v2421_v24  ;;  %v567_v31 = vsel %vm566_vm7, %v2350_v8, %v565_v28  ;;  %v790_v18 = vadd.f32 1e-06, %v668_v42  ;;  %vm587_vm0 = vcmp.eq.f32.partialorder %v2413_v3, inf }
 0x180   : > { %v498_v26 = vpop.xlane.xlu1 %497  ;;  %1625 = vrsqrt.f32 %v2432_v9  ;;  %vm699_vm1 = vcmp.eq.f32.partialorder %v2421_v24, inf  ;;  %vm680_vm2 = vcmp.eq.f32.partialorder %v2371_v58, 0.0  ;;  %vm594_vm3 = vcmp.eq.f32.partialorder %v2432_v9, inf }
 0x181   : > { %v468_v41 = vpop.xlane.xlu0 %467  ;;  %v2465_v22 = vmul.f32 0.007874016, %v498_v26  ;;  %1627 = vrcp.f32 %v775_v13  ;;  %v1610_v26 = vpop.eup %1609 }
 0x182   : > { %v2469_v17 = vmul.f32 0.007874016, %v468_v41  ;;  %v1612_v13 = vpop.eup %1611  ;;  %v677_v41 = vmul.f32 %v1610_v26, %v2371_v58  ;;  %v672_v26 = vsel %vm671_vm6, %v2353_v11, %v670_v55  ;;  %v2524_v55 = vld [vmem:[%s3135_s2] ss:$0 sm:$0xff] }
 0x183   : > { %1629 = vrsqrt.f32 %v2465_v22  ;;  %vm706_vm4 = vcmp.eq.f32.partialorder %v2465_v22, inf }
 0x184   : > { %v500_v63 = vpop.xlane.xlu1 %499  ;;  %1631 = vrsqrt.f32 %v2469_v17  ;;  %vm601_vm5 = vcmp.eq.f32.partialorder %v2469_v17, inf }
 0x185   : > { %v470_v29 = vpop.xlane.xlu0 %469  ;;  %v2473_v2 = vmul.f32 0.007874016, %v500_v63  ;;  %v570_v63 = vsel %vm568_vm8, %v569_v5, %v567_v31  ;;  %v572_v5 = vmul.f32 %v1612_v13, %v2381_v36 }
 0x186   : > { %v2478_v16 = vmul.f32 0.007874016, %v470_v29  ;;  %v1614_v29 = vpop.eup %1613  ;;  %v776_v42 = vadd.f32 1e-06, %v570_v63 }
 0x187   : > { %1633 = vrsqrt.f32 %v2473_v2  ;;  %v1616_v38 = vpop.eup %1615  ;;  %v684_v13 = vmul.f32 %v1614_v29, %v2384_v51  ;;  %v2529_v29 = vsel %vm678_vm9, %v2371_v58, %v677_v41  ;;  %v574_v46 = vsel %vm573_vm10, %v2381_v36, %v572_v5 }
 0x188   : > { %v502_v7 = vpop.xlane.xlu1 %501  ;;  %1635 = vrsqrt.f32 %v2478_v16  ;;  %v1618_v31 = vpop.eup %1617  ;;  %vm713_vm6 = vcmp.eq.f32.partialorder %v2473_v2, inf  ;;  %vm608_vm7 = vcmp.eq.f32.partialorder %v2478_v16, inf  ;;  %vm687_vm9 = vcmp.eq.f32.partialorder %v2384_v51, 0.0 }
 0x189   : > { %v472_v61 = vpop.xlane.xlu0 %471  ;;  %v2483_v4 = vmul.f32 0.007874016, %v502_v7  ;;  %v1620_v52 = vpop.eup %1619  ;;  %v691_v23 = vmul.f32 %v1618_v31, %v2401_v32  ;;  %v3177_v31 = vand.u32 2147483648, %v2353_v11  ;;  %vm582_vm10 = vcmp.eq.f32.partialorder %v2394_v30, 0.0 }
 0x18a   : > { %v2492_v28 = vmul.f32 0.007874016, %v472_v61 }
 0x18b   : > { %1637 = vrsqrt.f32 %v2483_v4  ;;  %v675_v5 = vsel %vm673_vm11, %v3177_v31, %v672_v26  ;;  %v3178_v31 = vand.u32 2147483648, %v2381_v36  ;;  %vm720_vm8 = vcmp.eq.f32.partialorder %v2483_v4, inf }
 0x18c   : > { %v504_v39 = vpop.xlane.xlu1 %503  ;;  %1639 = vrcp.f32 %v790_v18  ;;  %v877_v18 = vmul.f32 %v1620_v52, %v2365_v56  ;;  %v2550_v56 = vsel %vm685_vm12, %v2384_v51, %v684_v13  ;;  %vm615_vm11 = vcmp.eq.f32.partialorder %v2492_v28, inf }
 0x18d   : > { %v474_v7 = vpop.xlane.xlu0 %473  ;;  %v2504_v8 = vmul.f32 0.007874016, %v504_v39  ;;  %1641 = vrsqrt.f32 %v2492_v28  ;;  %v1622_v39 = vpop.eup %1621 }
 0x18e   : > { %v2508_v60 = vmul.f32 0.007874016, %v474_v7  ;;  %v1624_v53 = vpop.eup %1623  ;;  %v579_v7 = vmul.f32 %v1616_v38, %v2394_v30  ;;  %v916_v54 = vadd.f32 %v2524_v55, %v877_v18  ;;  %v586_v52 = vmul.f32 %v1622_v39, %v2413_v3 }
 0x18f   : > { %1643 = vrsqrt.f32 %v2504_v8  ;;  %v1626_v1 = vpop.eup %1625  ;;  %v698_v13 = vmul.f32 %v1624_v53, %v2421_v24  ;;  %v2578_v39 = vsel %vm692_vm15, %v2401_v32, %v691_v23  ;;  %vm727_vm12 = vcmp.eq.f32.partialorder %v2504_v8, inf }
 0x190   : > { %v506_v63 = vpop.xlane.xlu1 %505  ;;  %1645 = vrsqrt.f32 %v2508_v60  ;;  %v1628_v41 = vpop.eup %1627  ;;  %v2562_v18 = vsel %vm580_vm13, %v2394_v30, %v579_v7  ;;  %1458 = vmatprep.mubr.f32.mxu0 %v916_v54  ;;  %v593_v38 = vmul.f32 %v1626_v1, %v2432_v9  ;;  %v577_v7 = vsel %vm575_vm14, %v3178_v31, %v574_v46 }
 0x191   : > { %v476_v61 = vpop.xlane.xlu0 %475  ;;  %v2539_v62 = vmul.f32 0.007874016, %v506_v63  ;;  %1647 = vrcp.f32 %v776_v42  ;;  %v1630_v63 = vpop.eup %1629  ;;  %v878_v26 = vmul.f32 %v1628_v41, %v2357_v47  ;;  %v791_v47 = vadd.f32 1e-06, %v675_v5 }
 0x192   : > { %v2541_v20 = vmul.f32 0.007874016, %v476_v61  ;;  %v1632_v53 = vpop.eup %1631  ;;  %v2589_v46 = vsel %vm587_vm0, %v2413_v3, %v586_v52  ;;  %v705_v5 = vmul.f32 %v1630_v63, %v2465_v22  ;;  %v777_v52 = vadd.f32 1e-06, %v577_v7 }
 0x193   : > { %1649 = vrsqrt.f32 %v2539_v62  ;;  %v917_v31 = vadd.f32 %v2524_v55, %v878_v26  ;;  %v2607_v26 = vsel %vm594_vm3, %v2432_v9, %v593_v38  ;;  %v600_v23 = vmul.f32 %v1632_v53, %v2469_v17 }
 0x194   : > { %v508_v42 = vpop.xlane.xlu1 %507  ;;  %1651 = vrsqrt.f32 %v2541_v20  ;;  %v1634_v41 = vpop.eup %1633  ;;  %vm622_vm13 = vcmp.eq.f32.partialorder %v2508_v60, inf  ;;  %vm694_vm14 = vcmp.eq.f32.partialorder %v2401_v32, 0.0  ;;  %vm589_vm15 = vcmp.eq.f32.partialorder %v2413_v3, 0.0 }
 0x195   : > { %v478_v61 = vpop.xlane.xlu0 %477  ;;  %v2582_v54 = vmul.f32 0.007874016, %v508_v42  ;;  %v1636_v25 = vpop.eup %1635  ;;  %1459 = vmatmul.mubr.f32.vlgmr.msra.gmra.mxu0 %v917_v31  ;;  %v712_v36 = vmul.f32 %v1634_v41, %v2473_v2  ;;  %v2630_v41 = vsel %vm706_vm4, %v2465_v22, %v705_v5  ;;  %vm734_vm0 = vcmp.eq.f32.partialorder %v2539_v62, inf }
 0x196   : > { %v2584_v1 = vmul.f32 0.007874016, %v478_v61  ;;  %v2598_v61 = vsel %vm699_vm1, %v2421_v24, %v698_v13  ;;  %v3179_v13 = vand.u32 2147483648, %v2371_v58  ;;  %v607_v21 = vmul.f32 %v1636_v25, %v2478_v16 }
 0x197   : > { %1653 = vrsqrt.f32 %v2582_v54  ;;  %vm629_vm1 = vcmp.eq.f32.partialorder %v2541_v20, inf  ;;  %vm701_vm3 = vcmp.eq.f32.partialorder %v2421_v24, 0.0  ;;  %vm596_vm4 = vcmp.eq.f32.partialorder %v2432_v9, 0.0 }
 0x198   : > { %v510_v11 = vpop.xlane.xlu1 %509  ;;  %v1638_v14 = vpop.eup %1637  ;;  %1655 = vrsqrt.f32 %v2584_v1  ;;  %v682_v63 = vsel %vm680_vm2, %v3179_v13, %v2529_v29  ;;  %vm741_vm2 = vcmp.eq.f32.partialorder %v2582_v54, inf }
 0x199   : > { %v480_v42 = vpop.xlane.xlu0 %479  ;;  %v1640_v7 = vpop.eup %1639  ;;  %1657 = vrcp.f32 %v791_v47  ;;  %v2623_v15 = vmul.f32 0.007874016, %v510_v11  ;;  %v719_v47 = vmul.f32 %v1638_v14, %v2483_v4  ;;  %v792_v25 = vadd.f32 1e-06, %v682_v63 }
 0x19a   : > { %v1642_v53 = vpop.eup %1641  ;;  %v893_v31 = vmul.f32 %v1640_v7, %v2375_v37  ;;  %v2625_v34 = vmul.f32 0.007874016, %v480_v42  ;;  %1659 = vrcp.f32 %v777_v52  ;;  %v2637_v37 = vsel %vm601_vm5, %v2469_v17, %v600_v23 }
 0x19b   : > { %1661 = vrsqrt.f32 %v2623_v15  ;;  %v614_v14 = vmul.f32 %v1642_v53, %v2492_v28  ;;  %v2652_v23 = vsel %vm713_vm6, %v2473_v2, %v712_v36  ;;  %v2657_v63 = vsel %vm608_vm7, %v2478_v16, %v607_v21 }
 0x19c   : > { %v512_v58 = vpop.xlane.xlu1 %511  ;;  %v1644_v29 = vpop.eup %1643  ;;  %v932_v11 = vadd.f32 %v2524_v55, %v893_v31  ;;  %1663 = vrsqrt.f32 %v2625_v34  ;;  %v2665_v52 = vsel %vm720_vm8, %v2483_v4, %v719_v47  ;;  %vm636_vm5 = vcmp.eq.f32.partialorder %v2584_v1, inf }
 0x19d   : > { %v1646_v13 = vpop.eup %1645  ;;  %v2641_v42 = vmul.f32 0.007874016, %v512_v58  ;;  %v482_v5 = vpop.xlane.xlu0 %481  ;;  %v726_v36 = vmul.f32 %v1644_v29, %v2504_v8  ;;  %1665 = vrcp.f32 %v792_v25  ;;  %v2679_v29 = vsel %vm615_vm11, %v2492_v28, %v614_v14 }
 0x19e   : > { %v1648_v7 = vpop.eup %1647  ;;  %1482 = vmatprep.mubr.f32.mxu1 %v932_v11  ;;  %v621_v53 = vmul.f32 %v1646_v13, %v2508_v60  ;;  %v2681_v47 = vmul.f32 0.007874016, %v482_v5  ;;  %v3180_v25 = vand.u32 2147483648, %v2394_v30  ;;  %vm748_vm6 = vcmp.eq.f32.partialorder %v2623_v15, inf }
 0x19f   : > { %v879_v31 = vmul.f32 %v1648_v7, %v2369_v57  ;;  %1667 = vrsqrt.f32 %v2641_v42  ;;  %v3181_v7 = vand.u32 2147483648, %v2384_v51  ;;  %v2700_v30 = vsel %vm727_vm12, %v2504_v8, %v726_v36 }
 0x1a0   : > { %v1650_v58 = vpop.eup %1649  ;;  %v514_v19 = vpop.xlane.xlu1 %513  ;;  %v584_v13 = vsel %vm582_vm10, %v3180_v25, %v2562_v18  ;;  %1669 = vrsqrt.f32 %v2681_v47  ;;  %vm643_vm7 = vcmp.eq.f32.partialorder %v2625_v34, inf  ;;  %vm708_vm8 = vcmp.eq.f32.partialorder %v2465_v22, 0.0 }
 0x1a1   : > { %v1652_v38 = vpop.eup %1651  ;;  %v918_v57 = vadd.f32 %v2524_v55, %v879_v31  ;;  %v689_v31 = vsel %vm687_vm9, %v3181_v7, %v2550_v56  ;;  %v733_v21 = vmul.f32 %v1650_v58, %v2539_v62  ;;  %v778_v14 = vadd.f32 1e-06, %v584_v13  ;;  %v484_v10 = vpop.xlane.xlu0 %483 }
 0x1a2   : > { %v793_v5 = vadd.f32 1e-06, %v689_v31  ;;  %v2695_v11 = vmul.f32 0.007874016, %v514_v19  ;;  %v628_v18 = vmul.f32 %v1652_v38, %v2541_v20  ;;  %v2709_v19 = vsel %vm622_vm13, %v2508_v60, %v621_v53 }
 0x1a3   : > { %1461 = vmatprep.mubr.f32.mxu0 %v918_v57  ;;  %1671 = vrcp.f32 %v778_v14  ;;  %vm603_vm9 = vcmp.eq.f32.partialorder %v2469_v17, 0.0  ;;  %vm610_vm10 = vcmp.eq.f32.partialorder %v2478_v16, 0.0  ;;  %v2718_v25 = vmul.f32 0.007874016, %v484_v10 }
 0x1a4   : > { %v1654_v56 = vpop.eup %1653  ;;  %1673 = vrcp.f32 %v793_v5  ;;  %v2723_v13 = vsel %vm734_vm0, %v2539_v62, %v733_v21  ;;  %v3182_v7 = vand.u32 2147483648, %v2413_v3  ;;  %v3183_v14 = vand.u32 2147483648, %v2401_v32  ;;  %v516_v5 = vpop.xlane.xlu1 %515 }
 0x1a5   : > { %v1656_v36 = vpop.eup %1655  ;;  %v740_v38 = vmul.f32 %v1654_v56, %v2582_v54  ;;  %1675 = vrsqrt.f32 %v2695_v11  ;;  %vm715_vm11 = vcmp.eq.f32.partialorder %v2473_v2, 0.0  ;;  %v2740_v21 = vsel %vm629_vm1, %v2541_v20, %v628_v18 }
 0x1a6   : > { %v1658_v53 = vpop.eup %1657  ;;  %v591_v31 = vsel %vm589_vm15, %v3182_v7, %v2589_v46  ;;  %v696_v10 = vsel %vm694_vm14, %v3183_v14, %v2578_v39  ;;  %v635_v56 = vmul.f32 %v1656_v36, %v2584_v1  ;;  %vm755_vm12 = vcmp.eq.f32.partialorder %v2641_v42, inf }
 0x1a7   : > { %v894_v57 = vmul.f32 %v1658_v53, %v2361_v48  ;;  %1677 = vrsqrt.f32 %v2718_v25  ;;  %v1660_v3 = vpop.eup %1659  ;;  %vm617_vm13 = vcmp.eq.f32.partialorder %v2492_v28, 0.0  ;;  %v2750_v32 = vsel %vm741_vm2, %v2582_v54, %v740_v38 }
 0x1a8   : > { %v653_v39 = vand.u32 2147483648, %v2681_v47  ;;  %v765_v46 = vand.u32 2147483648, %v2695_v11  ;;  %v779_v18 = vadd.f32 1e-06, %v591_v31  ;;  %v1662_v36 = vpop.eup %1661  ;;  %vm722_vm14 = vcmp.eq.f32.partialorder %v2483_v4, 0.0 }
 0x1a9   : > { %v933_v48 = vadd.f32 %v2524_v55, %v894_v57  ;;  %v880_v53 = vmul.f32 %v1660_v3, %v2388_v0  ;;  %v794_v7 = vadd.f32 1e-06, %v696_v10  ;;  %v2757_v14 = vmul.f32 0.007874016, %v516_v5  ;;  %v1664_v51 = vpop.eup %1663 }
 0x1aa   : > { %v747_v58 = vmul.f32 %v1662_v36, %v2623_v15  ;;  %vm650_vm15 = vcmp.eq.f32.partialorder %v2681_v47, inf  ;;  %1679 = vrcp.f32 %v779_v18  ;;  %v3184_v38 = vand.u32 2147483648, %v2432_v9  ;;  %v1666_v9 = vpop.eup %1665 }
 0x1ab   : > { %v3185_v57 = vand.u32 2147483648, %v2421_v24  ;;  %vm624_vm0 = vcmp.eq.f32.partialorder %v2508_v60, 0.0  ;;  %v2775_v10 = vsel %vm636_vm5, %v2584_v1, %v635_v56  ;;  %1483 = vmatmul.mubr.f32.vlgmr.msra.gmra.mxu1 %v933_v48  ;;  %v642_v5 = vmul.f32 %v1664_v51, %v2625_v34 }
 0x1ac   : > { %v598_v31 = vsel %vm596_vm4, %v3184_v38, %v2607_v26  ;;  %v919_v3 = vadd.f32 %v2524_v55, %v880_v53  ;;  %1681 = vrcp.f32 %v794_v7  ;;  %v2782_v26 = vsel %vm748_vm6, %v2623_v15, %v747_v58  ;;  %v1668_v56 = vpop.eup %1667 }
 0x1ad   : > { %v703_v0 = vsel %vm701_vm3, %v3185_v57, %v2598_v61  ;;  %v660_v24 = vand.u32 2147483648, %v2718_v25  ;;  %1683 = vrsqrt.f32 %v2757_v14  ;;  %v772_v61 = vand.u32 2147483648, %v2757_v14 }
 0x1ae   : > { %vm729_vm1 = vcmp.eq.f32.partialorder %v2504_v8, 0.0  ;;  %vm631_vm2 = vcmp.eq.f32.partialorder %v2541_v20, 0.0  ;;  %v2792_v51 = vsel %vm643_vm7, %v2625_v34, %v642_v5  ;;  %1462 = vmatmul.mubr.f32.gmra.mxu0 %v919_v3  ;;  %v895_v58 = vmul.f32 %v1666_v9, %v2379_v44  ;;  %v1670_v5 = vpop.eup %1669 }
 0x1af   : > { %vm762_vm3 = vcmp.eq.f32.partialorder %v2695_v11, inf  ;;  %v780_v18 = vadd.f32 1e-06, %v598_v31  ;;  %v795_v36 = vadd.f32 1e-06, %v703_v0  ;;  %v754_v48 = vmul.f32 %v1668_v56, %v2641_v42 }
 0x1b0   : > { %vm657_vm4 = vcmp.eq.f32.partialorder %v2718_v25, inf  ;;  %v3186_v53 = vand.u32 2147483648, %v2469_v17  ;;  %v3187_v38 = vand.u32 2147483648, %v2465_v22  ;;  %v3188_v31 = vand.u32 2147483648, %v2478_v16  ;;  %v1672_v3 = vpop.eup %1671 }
 0x1b1   : > { %vm736_vm5 = vcmp.eq.f32.partialorder %v2539_v62, 0.0  ;;  %vm638_vm6 = vcmp.eq.f32.partialorder %v2584_v1, 0.0  ;;  %v934_v0 = vadd.f32 %v2524_v55, %v895_v58  ;;  %vm659_vm7 = vcmp.eq.f32.partialorder %v2718_v25, 0.0 }
 0x1b2   : > { %v605_v7 = vsel %vm603_vm9, %v3186_v53, %v2637_v37  ;;  %v710_v44 = vsel %vm708_vm8, %v3187_v38, %v2630_v41  ;;  %v612_v57 = vsel %vm610_vm10, %v3188_v31, %v2657_v63  ;;  %1685 = vrcp.f32 %v780_v18 }
 0x1b3   : > { %v781_v17 = vadd.f32 1e-06, %v605_v7  ;;  %v796_v37 = vadd.f32 1e-06, %v710_v44  ;;  %v2820_v22 = vsel %vm755_vm12, %v2641_v42, %v754_v48  ;;  %1687 = vrcp.f32 %v795_v36  ;;  %1485 = vmatprep.mubr.f32.mxu1 %v934_v0  ;;  %v1674_v36 = vpop.eup %1673 }
 0x1b4   : > { %v782_v16 = vadd.f32 1e-06, %v612_v57  ;;  %v3189_v41 = vand.u32 2147483648, %v2473_v2  ;;  %v649_v9 = vmul.f32 %v1670_v5, %v2681_v47  ;;  %v3190_v58 = vand.u32 2147483648, %v2492_v28  ;;  %v1676_v7 = vpop.eup %1675 }
 0x1b5   : > { %1689 = vrcp.f32 %v781_v17  ;;  %vm743_vm8 = vcmp.eq.f32.partialorder %v2582_v54, 0.0  ;;  %vm645_vm9 = vcmp.eq.f32.partialorder %v2625_v34, 0.0  ;;  %v881_v2 = vmul.f32 %v1672_v3, %v2398_v6  ;;  %v1678_v6 = vpop.eup %1677 }
 0x1b6   : > { %v717_v63 = vsel %vm715_vm11, %v3189_v41, %v2652_v23  ;;  %v619_v18 = vsel %vm617_vm13, %v3190_v58, %v2679_v29  ;;  %1691 = vrcp.f32 %v796_v37  ;;  %v3191_v48 = vand.u32 2147483648, %v2483_v4 }
 0x1b7   : > { %v797_v56 = vadd.f32 1e-06, %v717_v63  ;;  %v783_v23 = vadd.f32 1e-06, %v619_v18  ;;  %v651_v28 = vsel %vm650_vm15, %v2681_v47, %v649_v9  ;;  %v896_v29 = vmul.f32 %v1674_v36, %v2392_v43 }
 0x1b8   : > { %v724_v53 = vsel %vm722_vm14, %v3191_v48, %v2665_v52  ;;  %vm769_vm10 = vcmp.eq.f32.partialorder %v2757_v14, inf  ;;  %1693 = vrcp.f32 %v782_v16  ;;  %vm750_vm11 = vcmp.eq.f32.partialorder %v2623_v15, 0.0  ;;  %v1680_v16 = vpop.eup %1679 }
 0x1b9   : > { %v798_v38 = vadd.f32 1e-06, %v724_v53  ;;  %vm652_vm12 = vcmp.eq.f32.partialorder %v2681_v47, 0.0  ;;  %v920_v44 = vadd.f32 %v2524_v55, %v881_v2  ;;  %v761_v4 = vmul.f32 %v1676_v7, %v2695_v11  ;;  %v1682_v9 = vpop.eup %1681 }
 0x1ba   : > { %vm771_vm13 = vcmp.eq.f32.partialorder %v2757_v14, 0.0  ;;  %1695 = vrcp.f32 %v797_v56  ;;  %v3192_v52 = vand.u32 2147483648, %v2508_v60  ;;  %v935_v31 = vadd.f32 %v2524_v55, %v896_v29  ;;  %v1684_v18 = vpop.eup %1683 }
 0x1bb   : > { %v656_v57 = vmul.f32 %v1678_v6, %v2718_v25  ;;  %1697 = vrcp.f32 %v783_v23  ;;  %1464 = vmatprep.mubr.f32.mxu0 %v920_v44  ;;  %v2861_v17 = vsel %vm762_vm3, %v2695_v11, %v761_v4  ;;  %v3193_v37 = vand.u32 2147483648, %v2504_v8 }
 0x1bc   : > { %v626_v43 = vsel %vm624_vm0, %v3192_v52, %v2709_v19  ;;  %1699 = vrcp.f32 %v798_v38  ;;  %v3194_v19 = vand.u32 2147483648, %v2541_v20  ;;  %vm757_vm14 = vcmp.eq.f32.partialorder %v2641_v42, 0.0  ;;  %1486 = vmatmul.mubr.f32.gmra.mxu1 %v935_v31 }
 0x1bd   : > { %v784_v0 = vadd.f32 1e-06, %v626_v43  ;;  %v731_v60 = vsel %vm729_vm1, %v3193_v37, %v2700_v30  ;;  %v658_v41 = vsel %vm657_vm4, %v2718_v25, %v656_v57  ;;  %v882_v20 = vmul.f32 %v1680_v16, %v2410_v33 }
 0x1be   : > { %v633_v5 = vsel %vm631_vm2, %v3194_v19, %v2740_v21  ;;  %v799_v63 = vadd.f32 1e-06, %v731_v60  ;;  %v661_v8 = vsel %vm659_vm7, %v660_v24, %v658_v41  ;;  %v3195_v30 = vand.u32 2147483648, %v2539_v62 }
 0x1bf   : > { %1701 = vrcp.f32 %v784_v0  ;;  %v785_v3 = vadd.f32 1e-06, %v633_v5  ;;  %v3196_v56 = vand.u32 2147483648, %v2584_v1  ;;  %vm764_vm15 = vcmp.eq.f32.partialorder %v2695_v11, 0.0  ;;  %v1686_v48 = vpop.eup %1685  ;;  %v1727_v11 = vld [vmem:[%s3134_s1] ss:$0 sm:$0xff] }
 0x1c0   : > { %v738_v21 = vsel %vm736_vm5, %v3195_v30, %v2723_v13  ;;  %v789_v36 = vadd.f32 1e-06, %v661_v8  ;;  %v897_v25 = vmul.f32 %v1682_v9, %v2405_v59  ;;  %1703 = vrcp.f32 %v799_v63  ;;  %v1688_v38 = vpop.eup %1687  ;;  %v3203_v9 = vld [vmem:[#allocation24_spill] sm:$0xff] }
 0x1c1   : > { %v640_v58 = vsel %vm638_vm6, %v3196_v56, %v2775_v10  ;;  %v800_v33 = vadd.f32 1e-06, %v738_v21  ;;  %v921_v24 = vadd.f32 %v2524_v55, %v882_v20  ;;  %v768_v2 = vmul.f32 %v1684_v18, %v2757_v14  ;;  %v3204_v20 = vld [vmem:[#allocation13_spill] sm:$0xff] }
 0x1c2   : > { %1705 = vrcp.f32 %v785_v3  ;;  %v786_v62 = vadd.f32 1e-06, %v640_v58  ;;  %v936_v13 = vadd.f32 %v2524_v55, %v897_v25  ;;  %v3197_v1 = vand.u32 2147483648, %v2582_v54  ;;  %v1690_v44 = vpop.eup %1689  ;;  %v3205_v58 = vld [vmem:[#allocation12_spill] sm:$0xff] }
 0x1c3   : > { %1707 = vrcp.f32 %v800_v33  ;;  %v3198_v59 = vand.u32 2147483648, %v2625_v34  ;;  %1465 = vmatmul.mubr.f32.gmra.mxu0 %v921_v24  ;;  %v770_v53 = vsel %vm769_vm10, %v2757_v14, %v768_v2  ;;  %v3199_v34 = vand.u32 2147483648, %v2623_v15  ;;  %v3206_v24 = vld [vmem:[#allocation15_spill] sm:$0xff] }
 0x1c4   : > { %v745_v10 = vsel %vm743_vm8, %v3197_v1, %v2750_v32  ;;  %1709 = vrcp.f32 %v786_v62  ;;  %1488 = vmatprep.mubr.f32.mxu1 %v936_v13  ;;  %v773_v54 = vsel %vm771_vm13, %v772_v61, %v770_v53  ;;  %v883_v32 = vmul.f32 %v1686_v48, %v2425_v35  ;;  %v1692_v61 = vpop.eup %1691 }
 0x1c5   : > { %v647_v23 = vsel %vm645_vm9, %v3198_v59, %v2792_v51  ;;  %v801_v7 = vadd.f32 1e-06, %v745_v10  ;;  %v752_v51 = vsel %vm750_vm11, %v3199_v34, %v2782_v26  ;;  %v654_v6 = vsel %vm652_vm12, %v653_v39, %v651_v28  ;;  %v1694_v15 = vpop.eup %1693  ;;  %v3207_v59 = vld [vmem:[#allocation14_spill] sm:$0xff]  ;;  %v3209_v34 = vld [vmem:[#allocation16_spill] sm:$0xff] }
 0x1c6   : > { %v787_v29 = vadd.f32 1e-06, %v647_v23  ;;  %v805_v4 = vadd.f32 1e-06, %v773_v54  ;;  %v898_v52 = vmul.f32 %v1688_v38, %v2417_v40  ;;  %v802_v14 = vadd.f32 1e-06, %v752_v51 }
 0x1c7   : > { %1711 = vrcp.f32 %v801_v7  ;;  %v922_v35 = vadd.f32 %v2524_v55, %v883_v32  ;;  %v884_v43 = vmul.f32 %v1690_v44, %v2436_v49  ;;  %v788_v31 = vadd.f32 1e-06, %v654_v6  ;;  %v1696_v39 = vpop.eup %1695 }
 0x1c8   : > { %1713 = vrcp.f32 %v787_v29  ;;  %v937_v26 = vadd.f32 %v2524_v55, %v898_v52  ;;  %v899_v57 = vmul.f32 %v1692_v61, %v2429_v27  ;;  %v3200_v47 = vand.u32 2147483648, %v2641_v42  ;;  %v1698_v37 = vpop.eup %1697  ;;  %v3208_v29 = vld [vmem:[#allocation17_spill] sm:$0xff] }
 0x1c9   : > { %1715 = vrcp.f32 %v802_v14  ;;  %1467 = vmatprep.mubr.f32.mxu0 %v922_v35  ;;  %v923_v28 = vadd.f32 %v2524_v55, %v884_v43  ;;  %v885_v49 = vmul.f32 %v1694_v15, %v2444_v45  ;;  %v900_v27 = vmul.f32 %v1696_v39, %v2440_v50  ;;  %v3201_v50 = vld [vmem:[#allocation23_spill] sm:$0xff] }
 0x1ca   : > { %v759_v40 = vsel %vm757_vm14, %v3200_v47, %v2820_v22  ;;  %1717 = vrcp.f32 %v788_v31  ;;  %1489 = vmatmul.mubr.f32.gmra.mxu1 %v937_v26  ;;  %v938_v60 = vadd.f32 %v2524_v55, %v899_v57  ;;  %v766_v42 = vsel %vm764_vm15, %v765_v46, %v2861_v17  ;;  %v1700_v22 = vpop.eup %1699  ;;  %v3202_v46 = vld [vmem:[#allocation11_spill] sm:$0xff] }
 0x1cb   : > { %v803_v0 = vadd.f32 1e-06, %v759_v40  ;;  %1719 = vrcp.f32 %v789_v36  ;;  %1468 = vmatmul.mubr.f32.gmra.mxu0 %v923_v28  ;;  %v924_v19 = vadd.f32 %v2524_v55, %v885_v49  ;;  %v886_v45 = vmul.f32 %v1698_v37, %v2454_v12  ;;  %v3210_v15 = vld [vmem:[#allocation19_spill] sm:$0xff]  ;;  %v3211_v40 = vld [vmem:[#allocation21_spill] sm:$0xff] }
 0x1cc   : > { %v804_v5 = vadd.f32 1e-06, %v766_v42  ;;  %v1702_v16 = vpop.eup %1701  ;;  %1491 = vmatprep.mubr.f32.mxu1 %v938_v60  ;;  %v939_v41 = vadd.f32 %v2524_v55, %v900_v27  ;;  %v901_v63 = vmul.f32 %v1700_v22, %v3201_v50  ;;  %v870_v17 = vmul.f32 %v1727_v11, %v3202_v46  ;;  %v3213_v42 = vld [vmem:[#allocation22_spill] sm:$0xff]  ;;  %v2981_v50 = vld [vmem:[%s3137_s4] ss:$0 sm:$0xff] }
 0x1cd   : > { %1721 = vrcp.f32 %v803_v0  ;;  %1470 = vmatprep.mubr.f32.mxu0 %v924_v19  ;;  %v925_v3 = vadd.f32 %v2524_v55, %v886_v45  ;;  %v887_v12 = vmul.f32 %v1702_v16, %v3203_v9  ;;  %v1704_v8 = vpop.eup %1703  ;;  %v856_v30 = vmul.f32 %v1727_v11, %v3204_v20  ;;  %v3212_v0 = vld [vmem:[#allocation18_spill] sm:$0xff]  ;;  %v3214_v45 = vld [vmem:[#allocation20_spill] sm:$0xff] }
 0x1ce   : > { %1723 = vrcp.f32 %v805_v4  ;;  %1492 = vmatmul.mubr.f32.gmra.mxu1 %v939_v41  ;;  %v940_v21 = vadd.f32 %v2524_v55, %v901_v63  ;;  %v871_v18 = vmul.f32 %v1727_v11, %v3205_v58  ;;  %v902_v25 = vmul.f32 %v1704_v8, %v870_v17  ;;  %v1728_v17 = vld [vmem:[%s2049_s7 + $0x8] sm:$0xff] }
 0x1cf   : > { %1725 = vrcp.f32 %v804_v5  ;;  %v1706_v56 = vpop.eup %1705  ;;  %1471 = vmatmul.mubr.f32.gmra.mxu0 %v925_v3  ;;  %v926_v36 = vadd.f32 %v2524_v55, %v887_v12  ;;  %v857_v2 = vmul.f32 %v1727_v11, %v3206_v24  ;;  %v872_v23 = vmul.f32 %v1727_v11, %v3207_v59 }
 0x1d0   : > { %v1708_v33 = vpop.eup %1707  ;;  %1494 = vmatprep.mubr.f32.mxu1 %v940_v21  ;;  %v888_v62 = vmul.f32 %v1706_v56, %v856_v30  ;;  %v941_v1 = vadd.f32 %v2524_v55, %v902_v25  ;;  %v858_v38 = vmul.f32 %v1727_v11, %v3208_v29  ;;  %v873_v51 = vmul.f32 %v1727_v11, %v3209_v34  ;;  %v1730_v56 = vld [vmem:[%s2049_s7 + $0x88] sm:$0xff] }
 0x1d1   : > { %v1710_v13 = vpop.eup %1709  ;;  %1473 = vmatprep.mubr.f32.mxu0 %v926_v36  ;;  %v903_v10 = vmul.f32 %v1708_v33, %v871_v18  ;;  %v1731_v33 = vld [vmem:[%s2049_s7 + $0x80] sm:$0xff] }
 0x1d2   : > { %v927_v48 = vadd.f32 %v2524_v55, %v888_v62  ;;  %v889_v53 = vmul.f32 %v1710_v13, %v857_v2  ;;  %1495 = vmatmul.mubr.f32.gmra.mxu1 %v941_v1  ;;  %v1732_v2 = vld [vmem:[%s2049_s7 + $0x18] sm:$0xff]  ;;  %v1733_v1 = vld [vmem:[%s2049_s7 + $0x10] sm:$0xff] }
 0x1d3   : > { %v942_v54 = vadd.f32 %v2524_v55, %v903_v10 }
 0x1d4   : > { %v1712_v7 = vpop.eup %1711  ;;  %1474 = vmatmul.mubr.f32.gmra.mxu0 %v927_v48  ;;  %v928_v6 = vadd.f32 %v2524_v55, %v889_v53  ;;  %v1734_v53 = vld [vmem:[%s2049_s7 + $0x98] sm:$0xff] }
 0x1d5   : > { %v1714_v32 = vpop.eup %1713  ;;  %v904_v44 = vmul.f32 %v1712_v7, %v872_v23  ;;  %1497 = vmatprep.mubr.f32.mxu1 %v942_v54 }
 0x1d6   : > { %v1716_v4 = vpop.eup %1715  ;;  %v890_v52 = vmul.f32 %v1714_v32, %v858_v38  ;;  %1476 = vmatprep.mubr.f32.mxu0 %v928_v6  ;;  %v1735_v38 = vld [vmem:[%s2049_s7 + $0x90] sm:$0xff]  ;;  %v1736_v6 = vld [vmem:[%s2049_s7 + $0x28] sm:$0xff] }
 0x1d7   : > { %v1718_v14 = vpop.eup %1717  ;;  %v943_v61 = vadd.f32 %v2524_v55, %v904_v44  ;;  %v905_v35 = vmul.f32 %v1716_v4, %v873_v51 }
 0x1d8   : > { %v1720_v43 = vpop.eup %1719  ;;  %v929_v31 = vadd.f32 %v2524_v55, %v890_v52  ;;  %v891_v26 = vmul.f32 %v1718_v14, %v3210_v15  ;;  %v1737_v52 = vld [vmem:[%s2049_s7 + $0x20] sm:$0xff] }
 0x1d9   : > { %1498 = vmatmul.mubr.f32.gmra.mxu1 %v943_v61  ;;  %v944_v47 = vadd.f32 %v2524_v55, %v905_v35  ;;  %v892_v39 = vmul.f32 %v1720_v43, %v3211_v40 }
 0x1da   : > { %v1722_v57 = vpop.eup %1721  ;;  %1477 = vmatmul.mubr.f32.gmra.mxu0 %v929_v31  ;;  %v930_v49 = vadd.f32 %v2524_v55, %v891_v26  ;;  %v1738_v26 = vld [vmem:[%s2049_s7 + $0xa8] sm:$0xff] }
 0x1db   : > { %v1724_v28 = vpop.eup %1723  ;;  %v906_v37 = vmul.f32 %v1722_v57, %v3212_v0  ;;  %1500 = vmatprep.mubr.f32.mxu1 %v944_v47  ;;  %v931_v27 = vadd.f32 %v2524_v55, %v892_v39  ;;  %v1739_v39 = vld [vmem:[%s2049_s7 + $0x38] sm:$0xff] }
 0x1dc   : > { %v1726_v60 = vpop.eup %1725  ;;  %v908_v22 = vmul.f32 %v1724_v28, %v3213_v42  ;;  %1479 = vmatprep.mubr.f32.mxu0 %v930_v49 }
 0x1dd   : > { %v945_v19 = vadd.f32 %v2524_v55, %v906_v37  ;;  %v907_v5 = vmul.f32 %v1726_v60, %v3214_v45  ;;  %v1740_v37 = vld [vmem:[%s2049_s7 + $0xa0] sm:$0xff] }
 0x1de   : > { %1480 = vmatmul.mubr.f32.gmra.mxu0 %v931_v27  ;;  %v947_v41 = vadd.f32 %v2524_v55, %v908_v22  ;;  %v1741_v22 = vld [vmem:[%s2049_s7 + $0x30] sm:$0xff] }
 0x1df   : > { %1501 = vmatmul.mubr.f32.gmra.mxu1 %v945_v19  ;;  %v946_v16 = vadd.f32 %v2524_v55, %v907_v5  ;;  %v1729_v55 = vld [vmem:[%s2049_s7] sm:$0xff] }
 0x1e1   : > { %1503 = vmatprep.mubr.f32.mxu1 %v946_v16  ;;  %v1742_v16 = vld [vmem:[%s2049_s7 + $0xb8] sm:$0xff] }
 0x1e3   : > { %1504 = vmatmul.mubr.f32.gmra.mxu1 %v947_v41 }
 0x255   : > { %v1460_v63 = vpop.f32.mrf.mxu0 }
 0x256   : > { %v1043_v11 = vadd.f32 %v1460_v63, %v2981_v50 }
 0x257   : > { %v1037_v46 = vpop.f32.mrf.mxu0 }
 0x258   : > { %v1197_v3 = vadd.f32 %v1728_v17, %v1043_v11  ;;  %v1038_v9 = vadd.f32 %v2981_v50, %v1037_v46  ;;  %v1743_v46 = vld [vmem:[%s2049_s7 + $0x48] sm:$0xff] }
 0x25a   : > { %1229 = vst [vmem:[%s2988_s15 + $0x8] sm:$0xff] %v1197_v3  ;;  %v1196_v12 = vadd.f32 %v1729_v55, %v1038_v9  ;;  %v1744_v9 = vld [vmem:[%s2049_s7 + $0xb0] sm:$0xff] }
 0x25c   : > { %1228 = vst [vmem:[%s2988_s15] sm:$0xff] %v1196_v12 }
 0x26b   : > { %v1484_v8 = vpop.f32.mrf.mxu1 }
 0x26c   : > { %v1123_v20 = vadd.f32 %v1484_v8, %v2981_v50  ;;  %v1745_v8 = vld [vmem:[%s2049_s7 + $0x40] sm:$0xff] }
 0x26d   : > { %v1117_v30 = vpop.f32.mrf.mxu1 }
 0x26e   : > { %v1463_v21 = vpop.f32.mrf.mxu0  ;;  %v1213_v58 = vadd.f32 %v1730_v56, %v1123_v20  ;;  %v1118_v18 = vadd.f32 %v2981_v50, %v1117_v30 }
 0x26f   : > { %v1053_v36 = vadd.f32 %v1463_v21, %v2981_v50 }
 0x270   : > { %v1047_v25 = vpop.f32.mrf.mxu0  ;;  %1245 = vst [vmem:[%s2988_s15 + $0x88] sm:$0xff] %v1213_v58  ;;  %v1212_v24 = vadd.f32 %v1731_v33, %v1118_v18  ;;  %v1746_v18 = vld [vmem:[%s2049_s7 + $0xc8] sm:$0xff] }
 0x271   : > { %v1199_v62 = vadd.f32 %v1732_v2, %v1053_v36  ;;  %v1048_v13 = vadd.f32 %v2981_v50, %v1047_v25 }
 0x272   : > { %1244 = vst [vmem:[%s2988_s15 + $0x80] sm:$0xff] %v1212_v24  ;;  %v1747_v24 = vld [vmem:[%s2049_s7 + $0x58] sm:$0xff] }
 0x273   : > { %1231 = vst [vmem:[%s2988_s15 + $0x18] sm:$0xff] %v1199_v62  ;;  %v1198_v10 = vadd.f32 %v1733_v1, %v1048_v13  ;;  %v1748_v13 = vld [vmem:[%s2049_s7 + $0xc0] sm:$0xff] }
 0x275   : > { %1230 = vst [vmem:[%s2988_s15 + $0x10] sm:$0xff] %v1198_v10 }
 0x27c   : > { %v1487_v59 = vpop.f32.mrf.mxu1 }
 0x27d   : > { %v1133_v23 = vadd.f32 %v1487_v59, %v2981_v50  ;;  %v1749_v59 = vld [vmem:[%s2049_s7 + $0x50] sm:$0xff] }
 0x27e   : > { %v1127_v48 = vpop.f32.mrf.mxu1 }
 0x27f   : > { %v1215_v7 = vadd.f32 %v1734_v53, %v1133_v23  ;;  %v1128_v29 = vadd.f32 %v2981_v50, %v1127_v48 }
 0x281   : > { %1247 = vst [vmem:[%s2988_s15 + $0x98] sm:$0xff] %v1215_v7  ;;  %v1214_v54 = vadd.f32 %v1735_v38, %v1128_v29  ;;  %v1750_v38 = vld [vmem:[%s2049_s7 + $0xd8] sm:$0xff] }
 0x283   : > { %v1466_v32 = vpop.f32.mrf.mxu0  ;;  %1246 = vst [vmem:[%s2988_s15 + $0x90] sm:$0xff] %v1214_v54 }
 0x284   : > { %v1063_v34 = vadd.f32 %v1466_v32, %v2981_v50 }
 0x285   : > { %v1057_v51 = vpop.f32.mrf.mxu0 }
 0x286   : > { %v1201_v44 = vadd.f32 %v1736_v6, %v1063_v34  ;;  %v1058_v4 = vadd.f32 %v2981_v50, %v1057_v51  ;;  %v1751_v51 = vld [vmem:[%s2049_s7 + $0x68] sm:$0xff] }
 0x288   : > { %1233 = vst [vmem:[%s2988_s15 + $0x28] sm:$0xff] %v1201_v44  ;;  %v1200_v14 = vadd.f32 %v1737_v52, %v1058_v4  ;;  %v1752_v4 = vld [vmem:[%s2049_s7 + $0xd0] sm:$0xff] }
 0x28a   : > { %v1490_v61 = vpop.f32.mrf.mxu1  ;;  %1232 = vst [vmem:[%s2988_s15 + $0x20] sm:$0xff] %v1200_v14 }
 0x28b   : > { %v1143_v35 = vadd.f32 %v1490_v61, %v2981_v50  ;;  %v1469_v43 = vpop.f32.mrf.mxu0 }
 0x28c   : > { %v1137_v31 = vpop.f32.mrf.mxu1  ;;  %v1073_v15 = vadd.f32 %v1469_v43, %v2981_v50 }
 0x28d   : > { %v1217_v57 = vadd.f32 %v1738_v26, %v1143_v35  ;;  %v1138_v47 = vadd.f32 %v2981_v50, %v1137_v31  ;;  %v1067_v40 = vpop.f32.mrf.mxu0  ;;  %v1753_v35 = vld [vmem:[%s2049_s7 + $0x60] sm:$0xff] }
 0x28e   : > { %v1203_v28 = vadd.f32 %v1739_v39, %v1073_v15  ;;  %v1068_v49 = vadd.f32 %v2981_v50, %v1067_v40  ;;  %v1493_v0 = vpop.f32.mrf.mxu1 }
 0x28f   : > { %1249 = vst [vmem:[%s2988_s15 + $0xa8] sm:$0xff] %v1217_v57  ;;  %v1216_v60 = vadd.f32 %v1740_v37, %v1138_v47  ;;  %v1153_v27 = vadd.f32 %v1493_v0, %v2981_v50  ;;  %v1472_v42 = vpop.f32.mrf.mxu0  ;;  %v1754_v47 = vld [vmem:[%s2049_s7 + $0xe8] sm:$0xff] }
 0x290   : > { %1235 = vst [vmem:[%s2988_s15 + $0x38] sm:$0xff] %v1203_v28  ;;  %v1202_v19 = vadd.f32 %v1741_v22, %v1068_v49  ;;  %v1147_v45 = vpop.f32.mrf.mxu1  ;;  %v1083_v5 = vadd.f32 %v1472_v42, %v2981_v50  ;;  %v1755_v28 = vld [vmem:[%s2049_s7 + $0x78] sm:$0xff]  ;;  %v1757_v42 = vld [vmem:[%s2049_s7 + $0x70] sm:$0xff] }
 0x291   : > { %1248 = vst [vmem:[%s2988_s15 + $0xa0] sm:$0xff] %v1216_v60  ;;  %v1219_v41 = vadd.f32 %v1742_v16, %v1153_v27  ;;  %v1148_v63 = vadd.f32 %v2981_v50, %v1147_v45  ;;  %v1077_v11 = vpop.f32.mrf.mxu0  ;;  %v1756_v60 = vld [vmem:[%s2049_s7 + $0xe0] sm:$0xff] }
 0x292   : > { %1234 = vst [vmem:[%s2988_s15 + $0x30] sm:$0xff] %v1202_v19  ;;  %v1205_v17 = vadd.f32 %v1743_v46, %v1083_v5  ;;  %v1078_v3 = vadd.f32 %v2981_v50, %v1077_v11  ;;  %v1496_v12 = vpop.f32.mrf.mxu1  ;;  %v1758_v5 = vld [vmem:[%s2049_s7 + $0xf8] sm:$0xff] }
 0x293   : > { %1251 = vst [vmem:[%s2988_s15 + $0xb8] sm:$0xff] %v1219_v41  ;;  %v1218_v55 = vadd.f32 %v1744_v9, %v1148_v63  ;;  %v1163_v30 = vadd.f32 %v1496_v12, %v2981_v50  ;;  %v1759_v63 = vld [vmem:[%s2049_s7 + $0xf0] sm:$0xff] }
 0x294   : > { %1237 = vst [vmem:[%s2988_s15 + $0x48] sm:$0xff] %v1205_v17  ;;  %v1204_v20 = vadd.f32 %v1745_v8, %v1078_v3  ;;  %v1475_v21 = vpop.f32.mrf.mxu0  ;;  %v1157_v56 = vpop.f32.mrf.mxu1 }
 0x295   : > { %1250 = vst [vmem:[%s2988_s15 + $0xb0] sm:$0xff] %v1218_v55  ;;  %v1093_v58 = vadd.f32 %v1475_v21, %v2981_v50  ;;  %v1221_v36 = vadd.f32 %v1746_v18, %v1163_v30  ;;  %v1158_v25 = vadd.f32 %v2981_v50, %v1157_v56 }
 0x296   : > { %1236 = vst [vmem:[%s2988_s15 + $0x40] sm:$0xff] %v1204_v20  ;;  %v1087_v33 = vpop.f32.mrf.mxu0 }
 0x297   : > { %v1207_v2 = vadd.f32 %v1747_v24, %v1093_v58  ;;  %v1088_v62 = vadd.f32 %v2981_v50, %v1087_v33  ;;  %1253 = vst [vmem:[%s2988_s15 + $0xc8] sm:$0xff] %v1221_v36  ;;  %v1220_v1 = vadd.f32 %v1748_v13, %v1158_v25 }
 0x299   : > { %v1499_v10 = vpop.f32.mrf.mxu1  ;;  %1239 = vst [vmem:[%s2988_s15 + $0x58] sm:$0xff] %v1207_v2  ;;  %v1206_v23 = vadd.f32 %v1749_v59, %v1088_v62  ;;  %1252 = vst [vmem:[%s2988_s15 + $0xc0] sm:$0xff] %v1220_v1 }
 0x29a   : > { %v1173_v48 = vadd.f32 %v1499_v10, %v2981_v50  ;;  %v1478_v53 = vpop.f32.mrf.mxu0 }
 0x29b   : > { %v1167_v7 = vpop.f32.mrf.mxu1  ;;  %v1103_v29 = vadd.f32 %v1478_v53, %v2981_v50  ;;  %1238 = vst [vmem:[%s2988_s15 + $0x50] sm:$0xff] %v1206_v23 }
 0x29c   : > { %v1223_v54 = vadd.f32 %v1750_v38, %v1173_v48  ;;  %v1168_v32 = vadd.f32 %v2981_v50, %v1167_v7  ;;  %v1097_v34 = vpop.f32.mrf.mxu0 }
 0x29d   : > { %v1209_v6 = vadd.f32 %v1751_v51, %v1103_v29  ;;  %v1098_v44 = vadd.f32 %v2981_v50, %v1097_v34 }
 0x29e   : > { %1255 = vst [vmem:[%s2988_s15 + $0xd8] sm:$0xff] %v1223_v54  ;;  %v1222_v52 = vadd.f32 %v1752_v4, %v1168_v32  ;;  %v1481_v61 = vpop.f32.mrf.mxu0 }
 0x29f   : > { %v1502_v14 = vpop.f32.mrf.mxu1  ;;  %1241 = vst [vmem:[%s2988_s15 + $0x68] sm:$0xff] %v1209_v6  ;;  %v1208_v43 = vadd.f32 %v1753_v35, %v1098_v44  ;;  %v1113_v15 = vadd.f32 %v1481_v61, %v2981_v50 }
 0x2a0   : > { %v1183_v31 = vadd.f32 %v1502_v14, %v2981_v50  ;;  %1254 = vst [vmem:[%s2988_s15 + $0xd0] sm:$0xff] %v1222_v52  ;;  %v1107_v57 = vpop.f32.mrf.mxu0 }
 0x2a1   : > { %v1177_v26 = vpop.f32.mrf.mxu1  ;;  %1240 = vst [vmem:[%s2988_s15 + $0x60] sm:$0xff] %v1208_v43  ;;  %v1211_v49 = vadd.f32 %v1755_v28, %v1113_v15  ;;  %v1108_v0 = vadd.f32 %v2981_v50, %v1107_v57 }
 0x2a2   : > { %v1225_v40 = vadd.f32 %v1754_v47, %v1183_v31  ;;  %v1178_v39 = vadd.f32 %v2981_v50, %v1177_v26 }
 0x2a3   : > { %v1505_v37 = vpop.f32.mrf.mxu1  ;;  %1243 = vst [vmem:[%s2988_s15 + $0x78] sm:$0xff] %v1211_v49  ;;  %v1210_v22 = vadd.f32 %v1757_v42, %v1108_v0 }
 0x2a4   : > { %1257 = vst [vmem:[%s2988_s15 + $0xe8] sm:$0xff] %v1225_v40  ;;  %v1224_v27 = vadd.f32 %v1756_v60, %v1178_v39  ;;  %v1193_v19 = vadd.f32 %v1505_v37, %v2981_v50 }
 0x2a5   : > { %v1187_v45 = vpop.f32.mrf.mxu1  ;;  %1242 = vst [vmem:[%s2988_s15 + $0x70] sm:$0xff] %v1210_v22 }
 0x2a6   : > { %1256 = vst [vmem:[%s2988_s15 + $0xe0] sm:$0xff] %v1224_v27  ;;  %v1227_v16 = vadd.f32 %v1758_v5, %v1193_v19  ;;  %v1188_v41 = vadd.f32 %v2981_v50, %v1187_v45 }
 0x2a8   : > { %1259 = vst [vmem:[%s2988_s15 + $0xf8] sm:$0xff] %v1227_v16  ;;  %v1226_v11 = vadd.f32 %v1759_v63, %v1188_v41 }
 0x2aa   : > { %1258 = vst [vmem:[%s2988_s15 + $0xf0] sm:$0xff] %v1226_v11 }
 0x2ab   : > { %1827 = shalt.err (!%p1824_p0)
}
 0x2ac   : > { %s1828_s7 = scalar_lea.hbm %s3085_s17, 4096  ;;  %s1832_s23 = scalar_lea.hbm %s3138_s5, 8192 }
 0x2ad   : > { %p1829_p5 = scmp.ne.s32.totalorder %s3085_s17, %s1828_s7  ;;  %p1833_p4 = scmp.lt.s32.totalorder %s3085_s17, %s3138_s5 }
 0x2ae   : > { %p1834_p6 = scmp.lt.s32.totalorder %s1832_s23, %s1828_s7 }
 0x2af   : > { %p1830_p2 = pnand %p1829_p5, %p3215_p11 }
 0x2b0   : > { %p1835_p8 = por %p1834_p6, %p1833_p4 }
 0x2b1   : > { %p1831_p1 = pneg %p1830_p2 }
 0x2b3   : > { %p1836_p3 = pnand %p1835_p8, %p1831_p1 }
 0x2b5   : > { %1839 = shalt.err (!%p1836_p3)
}
 0x2b6   : > { %s1889_s28 = smov 128   ;;  %s1890_s11 = smov 8  }
 0x2b7   : > { %1544 = dma.vmem_to_hbm [thread:$0]  (%p3215_p11), %s3087_s12, 4096, %s3085_s17, %s1261_s22, %s1889_s28, %s1889_s28, %s1890_s11  }
 0x2b8 PF: > { %s1289_s9 = sand.u32 1, %s1870_s18   ;;  %p3216_p7 = scmp.ne.s32.totalorder %s3152_s25, 0 }
 0x2b9   : > { %p3217_p9 = scmp.ge.s32.totalorder %s1882_s21, 2  ;;  %s1290_s24 = scalar_lea.sflag [#allocation4], %s1289_s9 }
 0x2bb   : > { %p1555_p10 = pnand %p3217_p9, %p3216_p7 }
 0x2bd   : > { %p1556_p12 = pneg %p1555_p10 }
 0x2bf   : > { %1865 = dma.done.wait (%p1556_p12), %s1290_s24, 4096  }
 0x2c0   : > { %1867 = vsyncadd (%p1556_p12), %s1290_s24, 4294963200  ;;  %p19_p13 = scmp.ge.s32.totalorder %s1975_s30, 4   ;;  %s3218_s18 = smov %s1874_s19 }
 0x2c1   : > { %s3219_s19 = smov %s1878_s20  ;;  %s3220_s20 = smov %s1995_s13 }
 0x2c2   : > { %s3221_s21 = smov %s1975_s30  ;;  %21 = sbr.rel (!%p19_p13) target bundleno = 6 (0x6), region = 89 }
 0x2c7   :  { %1295 = vsyncpa [#allocation3], 1 }
 0x2c8   :  { %1297 = vsyncpa [#allocation3 + $0x1], 1 }
 0x2c9   :  { %1298 = vsyncpa [#allocation6], 1 }
 0x2ca   :  { %1299 = vsyncpa [#allocation4], 1 }
 0x2cb   :  { %1301 = vsyncpa [#allocation4 + $0x1], 1 }

</bundles_post_ra>
